<compile_context>
chip_gen: v6e
topology: v6e:2x2x1
jax: 0.10.0
libtpu: 0.0.40
codegen_flags: <defaults>
</compile_context>

<pallas_src>
import random

import jax
import jax.numpy as jnp
from jax.experimental import pallas as pl
from jax.experimental.pallas import tpu as pltpu

# ---- small, deterministic hyperparameters implied by the module's forward ----
BATCH = 2
SRC_LEN = 8
TRG_LEN = 8
SRC_VOCAB = 16
TRG_VOCAB = 16          # decoder.output_dim
EMB_DIM = 128           # lane-aligned
HID_DIM = 128           # encoder.hid_dim == decoder.hid_dim
N_LAYERS = 2            # encoder.n_layers == decoder.n_layers
VPAD = 128              # lane-dense padded vocab width for the fc projection
NEG_BIG = -1e30         # bias value for padded vocab lanes (never wins argmax)


# --------------------------- shared in-kernel LSTM ---------------------------

def _lstm_stack_step(x, h_scr, c_scr, w_ref, b_ref):
    """Run the N_LAYERS stacked LSTM for one timestep.

    x: (B, E) f32 input.  h_scr/c_scr: VMEM scratch (N_LAYERS, B, H) f32,
    updated in place.  w_ref: (N_LAYERS, E+H, 4H) bf16 stacked [W_ih; W_hh].
    b_ref: (N_LAYERS, 1, 4H) f32.  Returns top-layer hidden state (B, H) f32.
    PyTorch gate order: i, f, g, o.
    """
    H = HID_DIM
    for layer in range(N_LAYERS):
        h = h_scr[layer]
        c = c_scr[layer]
        # single K=(E+H)=256 matmul instead of two K=128 matmuls
        xh = jnp.concatenate([x, h], axis=-1).astype(jnp.bfloat16)
        gates = (jnp.dot(xh, w_ref[layer], preferred_element_type=jnp.float32)
                 + b_ref[layer])
        i_g = jax.nn.sigmoid(gates[:, 0 * H:1 * H])
        f_g = jax.nn.sigmoid(gates[:, 1 * H:2 * H])
        g_g = jnp.tanh(gates[:, 2 * H:3 * H])
        o_g = jax.nn.sigmoid(gates[:, 3 * H:4 * H])
        c_new = f_g * c + i_g * g_g
        h_new = o_g * jnp.tanh(c_new)
        h_scr[layer] = h_new
        c_scr[layer] = c_new
        x = h_new
    return x


# ------------------------------ encoder kernel -------------------------------

def _encoder_kernel(emb_ref, w_ref, b_ref, h_out_ref, c_out_ref, h_scr, c_scr):
    t = pl.program_id(0)

    @pl.when(t == 0)
    def _():
        h_scr[...] = jnp.zeros_like(h_scr)
        c_scr[...] = jnp.zeros_like(c_scr)

    x = emb_ref[...].astype(jnp.float32)                  # (B, E)
    _lstm_stack_step(x, h_scr, c_scr, w_ref, b_ref)

    @pl.when(t == pl.num_programs(0) - 1)
    def _():
        h_out_ref[...] = h_scr[...]
        c_out_ref[...] = c_scr[...]


def encoder_forward(src, params):
    """src: (B, src_len) int32 -> final (hidden, cell): (N_LAYERS, B, H) f32."""
    B, L = src.shape
    emb = jnp.take(params["enc_emb"], src, axis=0)        # (B, L, E) glue gather
    emb = jnp.transpose(emb, (1, 0, 2))                   # (L, B, E) time-major

    grid_spec = pltpu.PrefetchScalarGridSpec(
        num_scalar_prefetch=0,
        grid=(L,),
        in_specs=[
            pl.BlockSpec((None, B, EMB_DIM), lambda t: (t, 0, 0)),
            pl.BlockSpec((N_LAYERS, EMB_DIM + HID_DIM, 4 * HID_DIM),
                         lambda t: (0, 0, 0)),
            pl.BlockSpec((N_LAYERS, 1, 4 * HID_DIM), lambda t: (0, 0, 0)),
        ],
        out_specs=(
            pl.BlockSpec((N_LAYERS, B, HID_DIM), lambda t: (0, 0, 0)),
            pl.BlockSpec((N_LAYERS, B, HID_DIM), lambda t: (0, 0, 0)),
        ),
        scratch_shapes=[
            pltpu.VMEM((N_LAYERS, B, HID_DIM), jnp.float32),
            pltpu.VMEM((N_LAYERS, B, HID_DIM), jnp.float32),
        ],
    )
    h, c = pl.pallas_call(
        _encoder_kernel,
        grid_spec=grid_spec,
        out_shape=(jax.ShapeDtypeStruct((N_LAYERS, B, HID_DIM), jnp.float32),
                   jax.ShapeDtypeStruct((N_LAYERS, B, HID_DIM), jnp.float32)),
        compiler_params=pltpu.CompilerParams(
            dimension_semantics=("arbitrary",)),   # sequential recurrence
    )(emb, params["enc_w"], params["enc_b"])
    return h, c


# ------------------------------ decoder kernel -------------------------------

def _decoder_kernel(tf_ref, trg_oh_ref, h0_ref, c0_ref, emb_ref, w_ref, b_ref,
                    fcw_ref, fcb_ref, logits_ref, h_scr, c_scr, x_scr):
    t = pl.program_id(0)

    @pl.when(t == 0)
    def _():
        h_scr[...] = h0_ref[...]
        c_scr[...] = c0_ref[...]
        x_scr[...] = trg_oh_ref[...]      # one-hot of trg[:, 0] (first input)

    # Embedding lookup as one-hot @ table (no in-kernel integer gather).
    x = jnp.dot(x_scr[...].astype(jnp.bfloat16), emb_ref[...],
                preferred_element_type=jnp.float32)        # (B, E)

    top = _lstm_stack_step(x, h_scr, c_scr, w_ref, b_ref)  # (B, H)

    # Fused, lane-dense (128-wide) vocab projection; padded lanes get -1e30.
    logits = (jnp.dot(top.astype(jnp.bfloat16), fcw_ref[...],
                      preferred_element_type=jnp.float32) + fcb_ref[...])
    logits_ref[...] = logits

    # Greedy argmax as a one-hot (first max wins), staying entirely in vregs.
    lane = jax.lax.broadcasted_iota(jnp.int32, logits.shape, 1)
    m = jnp.max(logits, axis=1, keepdims=True)
    first_idx = jnp.min(jnp.where(logits == m, lane, VPAD), axis=1,
                        keepdims=True)
    greedy_oh = (lane == first_idx).astype(jnp.float32)

    # Teacher forcing: next input = trg[:, t] if flag else greedy token.
    sel = (tf_ref[t] == 1).astype(jnp.float32)             # scalar from SMEM
    x_scr[...] = sel * trg_oh_ref[...] + (1.0 - sel) * greedy_oh


def decoder_forward(trg, h0, c0, tf_flags, params):
    """trg: (B, trg_len) int32 -> logits (B, trg_len, TRG_VOCAB) f32."""
    B, T = trg.shape
    trg_oh = jax.nn.one_hot(trg, VPAD, dtype=jnp.float32)  # (B, T, VPAD)
    trg_oh = jnp.transpose(trg_oh, (1, 0, 2))              # (T, B, VPAD)

    grid_spec = pltpu.PrefetchScalarGridSpec(
        num_scalar_prefetch=1,                              # teacher-forcing flags
        grid=(T,),
        in_specs=[
            pl.BlockSpec((None, B, VPAD), lambda t, tf: (t, 0, 0)),
            pl.BlockSpec((N_LAYERS, B, HID_DIM), lambda t, tf: (0, 0, 0)),
            pl.BlockSpec((N_LAYERS, B, HID_DIM), lambda t, tf: (0, 0, 0)),
            pl.BlockSpec((VPAD, EMB_DIM), lambda t, tf: (0, 0)),
            pl.BlockSpec((N_LAYERS, EMB_DIM + HID_DIM, 4 * HID_DIM),
                         lambda t, tf: (0, 0, 0)),
            pl.BlockSpec((N_LAYERS, 1, 4 * HID_DIM), lambda t, tf: (0, 0, 0)),
            pl.BlockSpec((HID_DIM, VPAD), lambda t, tf: (0, 0)),
            pl.BlockSpec((1, VPAD), lambda t, tf: (0, 0)),
        ],
        out_specs=pl.BlockSpec((None, B, VPAD), lambda t, tf: (t, 0, 0)),
        scratch_shapes=[
            pltpu.VMEM((N_LAYERS, B, HID_DIM), jnp.float32),   # h
            pltpu.VMEM((N_LAYERS, B, HID_DIM), jnp.float32),   # c
            pltpu.VMEM((B, VPAD), jnp.float32),                # current input one-hot
        ],
    )
    logits = pl.pallas_call(
        _decoder_kernel,
        grid_spec=grid_spec,
        out_shape=jax.ShapeDtypeStruct((T, B, VPAD), jnp.float32),
        compiler_params=pltpu.CompilerParams(
            dimension_semantics=("arbitrary",)),   # sequential recurrence
    )(tf_flags, trg_oh, h0, c0,
      params["dec_emb_pad"], params["dec_w"], params["dec_b"],
      params["fc_w_pad"], params["fc_b_pad"])

    # (T, B, VPAD) -> (B, T, TRG_VOCAB); strip the lane padding in glue.
    return jnp.transpose(logits, (1, 0, 2))[:, :, :TRG_VOCAB]


# ------------------------------ model glue ------------------------------------

def init_params(key):
    def nrm(k, shape, scale=0.08):
        return (scale * jax.random.normal(k, shape)).astype(jnp.float32)

    keys = iter(jax.random.split(key, 32))
    enc_w, enc_b, dec_w, dec_b = [], [], [], []
    for layer in range(N_LAYERS):
        in_dim = EMB_DIM if layer == 0 else HID_DIM
        # Pre-stacked [W_ih; W_hh] -> one K=(in+H) matmul per LSTM cell.
        enc_w.append(nrm(next(keys), (in_dim + HID_DIM, 4 * HID_DIM)))
        dec_w.append(nrm(next(keys), (in_dim + HID_DIM, 4 * HID_DIM)))
        enc_b.append(nrm(next(keys), (1, 4 * HID_DIM)))
        dec_b.append(nrm(next(keys), (1, 4 * HID_DIM)))

    dec_emb = nrm(next(keys), (TRG_VOCAB, EMB_DIM))
    dec_emb_pad = jnp.zeros((VPAD, EMB_DIM), jnp.float32).at[:TRG_VOCAB].set(dec_emb)

    fc_w = nrm(next(keys), (HID_DIM, TRG_VOCAB))
    fc_b = nrm(next(keys), (1, TRG_VOCAB))
    fc_w_pad = jnp.zeros((HID_DIM, VPAD), jnp.float32).at[:, :TRG_VOCAB].set(fc_w)
    fc_b_pad = jnp.full((1, VPAD), NEG_BIG, jnp.float32).at[:, :TRG_VOCAB].set(fc_b)

    return {
        # bf16 weight/embedding storage (MXU-native, halves DMA); f32 biases,
        # f32 accumulation, f32 elementwise state math (v5e-safe).
        "enc_emb": nrm(next(keys), (SRC_VOCAB, EMB_DIM)).astype(jnp.bfloat16),
        "dec_emb_pad": dec_emb_pad.astype(jnp.bfloat16),
        "enc_w": jnp.stack(enc_w).astype(jnp.bfloat16),     # (L, E+H, 4H)
        "enc_b": jnp.stack(enc_b),                          # (L, 1, 4H) f32
        "dec_w": jnp.stack(dec_w).astype(jnp.bfloat16),
        "dec_b": jnp.stack(dec_b),
        "fc_w_pad": fc_w_pad.astype(jnp.bfloat16),          # (H, VPAD)
        "fc_b_pad": fc_b_pad,                               # (1, VPAD) f32
    }


@jax.jit
def seq2seq_forward(src, trg, tf_flags, params):
    """Mirrors Seq2Seq.forward: outputs[:, t, :] = decoder step-t logits.

    tf_flags[t] == 1  ->  next decoder input is trg[:, t] (teacher forcing),
    else the greedy argmax of step t's logits.  (batch_size==1 unsqueeze in
    the PyTorch code is a no-op here: the kernel output is already (B, V).)
    """
    hidden, cell = encoder_forward(src, params)
    return decoder_forward(trg, hidden, cell, tf_flags, params)


# --------------------------------- main ---------------------------------------

if __name__ == "__main__":
    assert EMB_DIM == HID_DIM, "stacked (E+H, 4H) weights assume E == H"

    key = jax.random.PRNGKey(0)
    pkey, skey, tkey = jax.random.split(key, 3)
    params = init_params(pkey)

    src = jax.random.randint(skey, (BATCH, SRC_LEN), 0, SRC_VOCAB, dtype=jnp.int32)
    trg = jax.random.randint(tkey, (BATCH, TRG_LEN), 0, TRG_VOCAB, dtype=jnp.int32)

    # TODO(synk): PyTorch draws the teacher-forcing coin stochastically at each
    # step; here a seeded Python RNG precomputes the flags and they are fed to
    # the fused decoder kernel as scalar-prefetch data (so jit does not bake a
    # single branch pattern into the trace).
    py_rng = random.Random(0)
    tf_flags = jnp.array(
        [1 if py_rng.random() < 0.5 else 0 for _ in range(TRG_LEN)],
        dtype=jnp.int32)

    out = seq2seq_forward(src, trg, tf_flags, params)
    out = jax.block_until_ready(out)

    assert out.shape == (BATCH, TRG_LEN, TRG_VOCAB), out.shape
    assert out.dtype == jnp.float32
    assert bool(jnp.all(jnp.isfinite(out)))
    print("KERNEL_OK")
</pallas_src>

<mosaic_0001>
module attributes {stable_mosaic.version = 11 : i64} {
  func.func @_encoder_kernel(%arg0: i32, %arg1: memref<1x2x128xbf16, #tpu.memory_space<vmem>>, %arg2: memref<2x256x512xbf16, #tpu.memory_space<vmem>>, %arg3: memref<2x1x512xf32, #tpu.memory_space<vmem>>, %arg4: memref<2x2x128xf32, #tpu.memory_space<vmem>>, %arg5: memref<2x2x128xf32, #tpu.memory_space<vmem>>, %arg6: memref<2x2x128xf32, #tpu.memory_space<vmem>>, %arg7: memref<2x2x128xf32, #tpu.memory_space<vmem>>) attributes {dimension_semantics = [#tpu.dimension_semantics<arbitrary>], iteration_bounds = array<i64: 8>, scalar_prefetch = 0 : i64, scratch_operands = 2 : i64, tpu.core_type = #tpu.core_type<tc>, window_params = [{transform_indices = @transform_0, window_bounds = array<i64: 1, 2, 128>}, {pipeline_mode = #tpu.pipeline_mode<synchronous>, transform_indices = @transform_1, window_bounds = array<i64: 2, 256, 512>}, {pipeline_mode = #tpu.pipeline_mode<synchronous>, transform_indices = @transform_2, window_bounds = array<i64: 2, 1, 512>}, {pipeline_mode = #tpu.pipeline_mode<synchronous>, transform_indices = @transform_3, window_bounds = array<i64: 2, 2, 128>}, {pipeline_mode = #tpu.pipeline_mode<synchronous>, transform_indices = @transform_4, window_bounds = array<i64: 2, 2, 128>}]} {
    %c0_i32 = arith.constant 0 : i32
    %0 = arith.cmpi eq, %arg0, %c0_i32 : i32
    %1 = arith.extui %0 : i1 to i32
    %c0_i32_0 = arith.constant 0 : i32
    %2 = arith.cmpi ne, %1, %c0_i32_0 : i32
    scf.if %2 {
      %cst_46 = arith.constant 0.000000e+00 : f32
      %97 = vector.broadcast %cst_46 : f32 to vector<2x2x128xf32>
      %c0_47 = arith.constant 0 : index
      %c0_48 = arith.constant 0 : index
      %c0_49 = arith.constant 0 : index
      %98 = vector.load %arg6[%c0_47, %c0_48, %c0_49] : memref<2x2x128xf32, #tpu.memory_space<vmem>>, vector<2x2x128xf32>
      tpu.vector_store %arg6[%c0_47, %c0_48, %c0_49], %97 {strides = array<i32>} : memref<2x2x128xf32, #tpu.memory_space<vmem>>, vector<2x2x128xf32>,
      %cst_50 = arith.constant 0.000000e+00 : f32
      %99 = vector.broadcast %cst_50 : f32 to vector<2x2x128xf32>
      %c0_51 = arith.constant 0 : index
      %c0_52 = arith.constant 0 : index
      %c0_53 = arith.constant 0 : index
      %100 = vector.load %arg7[%c0_51, %c0_52, %c0_53] : memref<2x2x128xf32, #tpu.memory_space<vmem>>, vector<2x2x128xf32>
      tpu.vector_store %arg7[%c0_51, %c0_52, %c0_53], %99 {strides = array<i32>} : memref<2x2x128xf32, #tpu.memory_space<vmem>>, vector<2x2x128xf32>,
    } else {
    }
    %c0 = arith.constant 0 : index
    %c0_1 = arith.constant 0 : index
    %c0_2 = arith.constant 0 : index
    %3 = vector.load %arg1[%c0, %c0_1, %c0_2] : memref<1x2x128xbf16, #tpu.memory_space<vmem>>, vector<1x2x128xbf16>
    %4 = vector.shape_cast %3 : vector<1x2x128xbf16> to vector<2x128xbf16>
    %5 = arith.extf %4 : vector<2x128xbf16> to vector<2x128xf32>
    %c0_3 = arith.constant 0 : index
    %c0_4 = arith.constant 0 : index
    %c0_5 = arith.constant 0 : index
    %6 = vector.load %arg6[%c0_3, %c0_4, %c0_5] : memref<2x2x128xf32, #tpu.memory_space<vmem>>, vector<1x2x128xf32>
    %7 = vector.shape_cast %6 : vector<1x2x128xf32> to vector<2x128xf32>
    %c0_6 = arith.constant 0 : index
    %c0_7 = arith.constant 0 : index
    %c0_8 = arith.constant 0 : index
    %8 = vector.load %arg7[%c0_6, %c0_7, %c0_8] : memref<2x2x128xf32, #tpu.memory_space<vmem>>, vector<1x2x128xf32>
    %9 = vector.shape_cast %8 : vector<1x2x128xf32> to vector<2x128xf32>
    %10 = tpu.concatenate %5, %7 in 1 : vector<2x128xf32>, vector<2x128xf32> -> vector<2x256xf32>
    %11 = arith.truncf %10 : vector<2x256xf32> to vector<2x256xbf16>
    %c0_9 = arith.constant 0 : index
    %c0_10 = arith.constant 0 : index
    %c0_11 = arith.constant 0 : index
    %12 = vector.load %arg2[%c0_9, %c0_10, %c0_11] : memref<2x256x512xbf16, #tpu.memory_space<vmem>>, vector<1x256x512xbf16>
    %13 = vector.shape_cast %12 : vector<1x256x512xbf16> to vector<256x512xbf16>
    %cst = arith.constant dense<0.000000e+00> : vector<2x512xf32>
    %14 = tpu.matmul %11, %13, %cst {dimension_numbers = #tpu.dot_dimension_numbers<[1], [0], [0], [1], [0, 0, 1, 1], [], []>} : vector<2x256xbf16>, vector<256x512xbf16>, vector<2x512xf32> -> vector<2x512xf32>
    %c0_12 = arith.constant 0 : index
    %c0_13 = arith.constant 0 : index
    %c0_14 = arith.constant 0 : index
    %15 = vector.load %arg3[%c0_12, %c0_13, %c0_14] : memref<2x1x512xf32, #tpu.memory_space<vmem>>, vector<1x1x512xf32>
    %16 = vector.shape_cast %15 : vector<1x1x512xf32> to vector<1x512xf32>
    %17 = vector.broadcast %16 : vector<1x512xf32> to vector<2x512xf32>
    %18 = arith.addf %14, %17 : vector<2x512xf32>
    %19 = vector.extract_strided_slice %18 {offsets = [0, 0], sizes = [2, 128], strides = [1, 1]} : vector<2x512xf32> to vector<2x128xf32>
    %20 = arith.negf %19 : vector<2x128xf32>
    %21 = math.exp %20 : vector<2x128xf32>
    %cst_15 = arith.constant 1.000000e+00 : f32
    %22 = vector.broadcast %cst_15 : f32 to vector<2x128xf32>
    %23 = arith.addf %22, %21 : vector<2x128xf32>
    %24 = arith.divf %22, %23 : vector<2x128xf32>
    %25 = vector.extract_strided_slice %18 {offsets = [0, 128], sizes = [2, 128], strides = [1, 1]} : vector<2x512xf32> to vector<2x128xf32>
    %26 = arith.negf %25 : vector<2x128xf32>
    %27 = math.exp %26 : vector<2x128xf32>
    %cst_16 = arith.constant 1.000000e+00 : f32
    %28 = vector.broadcast %cst_16 : f32 to vector<2x128xf32>
    %29 = arith.addf %28, %27 : vector<2x128xf32>
    %30 = arith.divf %28, %29 : vector<2x128xf32>
    %31 = vector.extract_strided_slice %18 {offsets = [0, 256], sizes = [2, 128], strides = [1, 1]} : vector<2x512xf32> to vector<2x128xf32>
    %32 = math.tanh %31 : vector<2x128xf32>
    %33 = vector.extract_strided_slice %18 {offsets = [0, 384], sizes = [2, 128], strides = [1, 1]} : vector<2x512xf32> to vector<2x128xf32>
    %34 = arith.negf %33 : vector<2x128xf32>
    %35 = math.exp %34 : vector<2x128xf32>
    %cst_17 = arith.constant 1.000000e+00 : f32
    %36 = vector.broadcast %cst_17 : f32 to vector<2x128xf32>
    %37 = arith.addf %36, %35 : vector<2x128xf32>
    %38 = arith.divf %36, %37 : vector<2x128xf32>
    %39 = arith.mulf %30, %9 : vector<2x128xf32>
    %40 = arith.mulf %24, %32 : vector<2x128xf32>
    %41 = arith.addf %39, %40 : vector<2x128xf32>
    %42 = math.tanh %41 : vector<2x128xf32>
    %43 = arith.mulf %38, %42 : vector<2x128xf32>
    %c0_18 = arith.constant 0 : index
    %c0_19 = arith.constant 0 : index
    %c0_20 = arith.constant 0 : index
    %44 = vector.load %arg6[%c0_18, %c0_19, %c0_20] : memref<2x2x128xf32, #tpu.memory_space<vmem>>, vector<1x2x128xf32>
    %45 = vector.shape_cast %44 : vector<1x2x128xf32> to vector<2x128xf32>
    %46 = vector.shape_cast %43 : vector<2x128xf32> to vector<1x2x128xf32>
    tpu.vector_store %arg6[%c0_18, %c0_19, %c0_20], %46 {strides = array<i32>} : memref<2x2x128xf32, #tpu.memory_space<vmem>>, vector<1x2x128xf32>,
    %c0_21 = arith.constant 0 : index
    %c0_22 = arith.constant 0 : index
    %c0_23 = arith.constant 0 : index
    %47 = vector.load %arg7[%c0_21, %c0_22, %c0_23] : memref<2x2x128xf32, #tpu.memory_space<vmem>>, vector<1x2x128xf32>
    %48 = vector.shape_cast %47 : vector<1x2x128xf32> to vector<2x128xf32>
    %49 = vector.shape_cast %41 : vector<2x128xf32> to vector<1x2x128xf32>
    tpu.vector_store %arg7[%c0_21, %c0_22, %c0_23], %49 {strides = array<i32>} : memref<2x2x128xf32, #tpu.memory_space<vmem>>, vector<1x2x128xf32>,
    %c1 = arith.constant 1 : index
    %c0_24 = arith.constant 0 : index
    %c0_25 = arith.constant 0 : index
    %50 = vector.load %arg6[%c1, %c0_24, %c0_25] : memref<2x2x128xf32, #tpu.memory_space<vmem>>, vector<1x2x128xf32>
    %51 = vector.shape_cast %50 : vector<1x2x128xf32> to vector<2x128xf32>
    %c1_26 = arith.constant 1 : index
    %c0_27 = arith.constant 0 : index
    %c0_28 = arith.constant 0 : index
    %52 = vector.load %arg7[%c1_26, %c0_27, %c0_28] : memref<2x2x128xf32, #tpu.memory_space<vmem>>, vector<1x2x128xf32>
    %53 = vector.shape_cast %52 : vector<1x2x128xf32> to vector<2x128xf32>
    %54 = tpu.concatenate %43, %51 in 1 : vector<2x128xf32>, vector<2x128xf32> -> vector<2x256xf32>
    %55 = arith.truncf %54 : vector<2x256xf32> to vector<2x256xbf16>
    %c1_29 = arith.constant 1 : index
    %c0_30 = arith.constant 0 : index
    %c0_31 = arith.constant 0 : index
    %56 = vector.load %arg2[%c1_29, %c0_30, %c0_31] : memref<2x256x512xbf16, #tpu.memory_space<vmem>>, vector<1x256x512xbf16>
    %57 = vector.shape_cast %56 : vector<1x256x512xbf16> to vector<256x512xbf16>
    %cst_32 = arith.constant dense<0.000000e+00> : vector<2x512xf32>
    %58 = tpu.matmul %55, %57, %cst_32 {dimension_numbers = #tpu.dot_dimension_numbers<[1], [0], [0], [1], [0, 0, 1, 1], [], []>} : vector<2x256xbf16>, vector<256x512xbf16>, vector<2x512xf32> -> vector<2x512xf32>
    %c1_33 = arith.constant 1 : index
    %c0_34 = arith.constant 0 : index
    %c0_35 = arith.constant 0 : index
    %59 = vector.load %arg3[%c1_33, %c0_34, %c0_35] : memref<2x1x512xf32, #tpu.memory_space<vmem>>, vector<1x1x512xf32>
    %60 = vector.shape_cast %59 : vector<1x1x512xf32> to vector<1x512xf32>
    %61 = vector.broadcast %60 : vector<1x512xf32> to vector<2x512xf32>
    %62 = arith.addf %58, %61 : vector<2x512xf32>
    %63 = vector.extract_strided_slice %62 {offsets = [0, 0], sizes = [2, 128], strides = [1, 1]} : vector<2x512xf32> to vector<2x128xf32>
    %64 = arith.negf %63 : vector<2x128xf32>
    %65 = math.exp %64 : vector<2x128xf32>
    %cst_36 = arith.constant 1.000000e+00 : f32
    %66 = vector.broadcast %cst_36 : f32 to vector<2x128xf32>
    %67 = arith.addf %66, %65 : vector<2x128xf32>
    %68 = arith.divf %66, %67 : vector<2x128xf32>
    %69 = vector.extract_strided_slice %62 {offsets = [0, 128], sizes = [2, 128], strides = [1, 1]} : vector<2x512xf32> to vector<2x128xf32>
    %70 = arith.negf %69 : vector<2x128xf32>
    %71 = math.exp %70 : vector<2x128xf32>
    %cst_37 = arith.constant 1.000000e+00 : f32
    %72 = vector.broadcast %cst_37 : f32 to vector<2x128xf32>
    %73 = arith.addf %72, %71 : vector<2x128xf32>
    %74 = arith.divf %72, %73 : vector<2x128xf32>
    %75 = vector.extract_strided_slice %62 {offsets = [0, 256], sizes = [2, 128], strides = [1, 1]} : vector<2x512xf32> to vector<2x128xf32>
    %76 = math.tanh %75 : vector<2x128xf32>
    %77 = vector.extract_strided_slice %62 {offsets = [0, 384], sizes = [2, 128], strides = [1, 1]} : vector<2x512xf32> to vector<2x128xf32>
    %78 = arith.negf %77 : vector<2x128xf32>
    %79 = math.exp %78 : vector<2x128xf32>
    %cst_38 = arith.constant 1.000000e+00 : f32
    %80 = vector.broadcast %cst_38 : f32 to vector<2x128xf32>
    %81 = arith.addf %80, %79 : vector<2x128xf32>
    %82 = arith.divf %80, %81 : vector<2x128xf32>
    %83 = arith.mulf %74, %53 : vector<2x128xf32>
    %84 = arith.mulf %68, %76 : vector<2x128xf32>
    %85 = arith.addf %83, %84 : vector<2x128xf32>
    %86 = math.tanh %85 : vector<2x128xf32>
    %87 = arith.mulf %82, %86 : vector<2x128xf32>
    %c1_39 = arith.constant 1 : index
    %c0_40 = arith.constant 0 : index
    %c0_41 = arith.constant 0 : index
    %88 = vector.load %arg6[%c1_39, %c0_40, %c0_41] : memref<2x2x128xf32, #tpu.memory_space<vmem>>, vector<1x2x128xf32>
    %89 = vector.shape_cast %88 : vector<1x2x128xf32> to vector<2x128xf32>
    %90 = vector.shape_cast %87 : vector<2x128xf32> to vector<1x2x128xf32>
    tpu.vector_store %arg6[%c1_39, %c0_40, %c0_41], %90 {strides = array<i32>} : memref<2x2x128xf32, #tpu.memory_space<vmem>>, vector<1x2x128xf32>,
    %c1_42 = arith.constant 1 : index
    %c0_43 = arith.constant 0 : index
    %c0_44 = arith.constant 0 : index
    %91 = vector.load %arg7[%c1_42, %c0_43, %c0_44] : memref<2x2x128xf32, #tpu.memory_space<vmem>>, vector<1x2x128xf32>
    %92 = vector.shape_cast %91 : vector<1x2x128xf32> to vector<2x128xf32>
    %93 = vector.shape_cast %85 : vector<2x128xf32> to vector<1x2x128xf32>
    tpu.vector_store %arg7[%c1_42, %c0_43, %c0_44], %93 {strides = array<i32>} : memref<2x2x128xf32, #tpu.memory_space<vmem>>, vector<1x2x128xf32>,
    %c7_i32 = arith.constant 7 : i32
    %94 = arith.cmpi eq, %arg0, %c7_i32 : i32
    %95 = arith.extui %94 : i1 to i32
    %c0_i32_45 = arith.constant 0 : i32
    %96 = arith.cmpi ne, %95, %c0_i32_45 : i32
    scf.if %96 {
      %c0_46 = arith.constant 0 : index
      %c0_47 = arith.constant 0 : index
      %c0_48 = arith.constant 0 : index
      %97 = vector.load %arg6[%c0_46, %c0_47, %c0_48] : memref<2x2x128xf32, #tpu.memory_space<vmem>>, vector<2x2x128xf32>
      %c0_49 = arith.constant 0 : index
      %c0_50 = arith.constant 0 : index
      %c0_51 = arith.constant 0 : index
      %98 = vector.load %arg4[%c0_49, %c0_50, %c0_51] : memref<2x2x128xf32, #tpu.memory_space<vmem>>, vector<2x2x128xf32>
      tpu.vector_store %arg4[%c0_49, %c0_50, %c0_51], %97 {strides = array<i32>} : memref<2x2x128xf32, #tpu.memory_space<vmem>>, vector<2x2x128xf32>,
      %c0_52 = arith.constant 0 : index
      %c0_53 = arith.constant 0 : index
      %c0_54 = arith.constant 0 : index
      %99 = vector.load %arg7[%c0_52, %c0_53, %c0_54] : memref<2x2x128xf32, #tpu.memory_space<vmem>>, vector<2x2x128xf32>
      %c0_55 = arith.constant 0 : index
      %c0_56 = arith.constant 0 : index
      %c0_57 = arith.constant 0 : index
      %100 = vector.load %arg5[%c0_55, %c0_56, %c0_57] : memref<2x2x128xf32, #tpu.memory_space<vmem>>, vector<2x2x128xf32>
      tpu.vector_store %arg5[%c0_55, %c0_56, %c0_57], %99 {strides = array<i32>} : memref<2x2x128xf32, #tpu.memory_space<vmem>>, vector<2x2x128xf32>,
    } else {
    }
    return
  }
  func.func @transform_0(%arg0: i32) -> (i32, i32, i32) {
    %c0_i32 = arith.constant 0 : i32
    %c0_i32_0 = arith.constant 0 : i32
    %c0_i32_1 = arith.constant 0 : i32
    return %arg0, %c0_i32, %c0_i32_0 : i32, i32, i32
  }
  func.func @transform_1(%arg0: i32) -> (i32, i32, i32) {
    %c0_i32 = arith.constant 0 : i32
    %c0_i32_0 = arith.constant 0 : i32
    %c0_i32_1 = arith.constant 0 : i32
    %c0_i32_2 = arith.constant 0 : i32
    return %c0_i32, %c0_i32_0, %c0_i32_1 : i32, i32, i32
  }
  func.func @transform_2(%arg0: i32) -> (i32, i32, i32) {
    %c0_i32 = arith.constant 0 : i32
    %c0_i32_0 = arith.constant 0 : i32
    %c0_i32_1 = arith.constant 0 : i32
    %c0_i32_2 = arith.constant 0 : i32
    return %c0_i32, %c0_i32_0, %c0_i32_1 : i32, i32, i32
  }
  func.func @transform_3(%arg0: i32) -> (i32, i32, i32) {
    %c0_i32 = arith.constant 0 : i32
    %c0_i32_0 = arith.constant 0 : i32
    %c0_i32_1 = arith.constant 0 : i32
    %c0_i32_2 = arith.constant 0 : i32
    return %c0_i32, %c0_i32_0, %c0_i32_1 : i32, i32, i32
  }
  func.func @transform_4(%arg0: i32) -> (i32, i32, i32) {
    %c0_i32 = arith.constant 0 : i32
    %c0_i32_0 = arith.constant 0 : i32
    %c0_i32_1 = arith.constant 0 : i32
    %c0_i32_2 = arith.constant 0 : i32
    return %c0_i32, %c0_i32_0, %c0_i32_1 : i32, i32, i32
  }
}

module attributes {stable_mosaic.version = 11 : i64} {
  func.func @_decoder_kernel(%arg0: i32, %arg1: memref<8xi32, #tpu.memory_space<smem>>, %arg2: memref<1x2x128xf32, #tpu.memory_space<vmem>>, %arg3: memref<2x2x128xf32, #tpu.memory_space<vmem>>, %arg4: memref<2x2x128xf32, #tpu.memory_space<vmem>>, %arg5: memref<128x128xbf16, #tpu.memory_space<vmem>>, %arg6: memref<2x256x512xbf16, #tpu.memory_space<vmem>>, %arg7: memref<2x1x512xf32, #tpu.memory_space<vmem>>, %arg8: memref<128x128xbf16, #tpu.memory_space<vmem>>, %arg9: memref<1x128xf32, #tpu.memory_space<vmem>>, %arg10: memref<1x2x128xf32, #tpu.memory_space<vmem>>, %arg11: memref<2x2x128xf32, #tpu.memory_space<vmem>>, %arg12: memref<2x2x128xf32, #tpu.memory_space<vmem>>, %arg13: memref<2x128xf32, #tpu.memory_space<vmem>>) attributes {dimension_semantics = [#tpu.dimension_semantics<arbitrary>], iteration_bounds = array<i64: 8>, scalar_prefetch = 1 : i64, scratch_operands = 3 : i64, tpu.core_type = #tpu.core_type<tc>, window_params = [{transform_indices = @transform_0, window_bounds = array<i64: 1, 2, 128>}, {pipeline_mode = #tpu.pipeline_mode<synchronous>, transform_indices = @transform_1, window_bounds = array<i64: 2, 2, 128>}, {pipeline_mode = #tpu.pipeline_mode<synchronous>, transform_indices = @transform_2, window_bounds = array<i64: 2, 2, 128>}, {pipeline_mode = #tpu.pipeline_mode<synchronous>, transform_indices = @transform_3, window_bounds = array<i64: 128, 128>}, {pipeline_mode = #tpu.pipeline_mode<synchronous>, transform_indices = @transform_4, window_bounds = array<i64: 2, 256, 512>}, {pipeline_mode = #tpu.pipeline_mode<synchronous>, transform_indices = @transform_5, window_bounds = array<i64: 2, 1, 512>}, {pipeline_mode = #tpu.pipeline_mode<synchronous>, transform_indices = @transform_6, window_bounds = array<i64: 128, 128>}, {pipeline_mode = #tpu.pipeline_mode<synchronous>, transform_indices = @transform_7, window_bounds = array<i64: 1, 128>}, {transform_indices = @transform_8, window_bounds = array<i64: 1, 2, 128>}]} {
    %c0_i32 = arith.constant 0 : i32
    %0 = arith.cmpi eq, %arg0, %c0_i32 : i32
    %1 = arith.extui %0 : i1 to i32
    %c0_i32_0 = arith.constant 0 : i32
    %2 = arith.cmpi ne, %1, %c0_i32_0 : i32
    scf.if %2 {
      %c0_63 = arith.constant 0 : index
      %c0_64 = arith.constant 0 : index
      %c0_65 = arith.constant 0 : index
      %131 = vector.load %arg3[%c0_63, %c0_64, %c0_65] : memref<2x2x128xf32, #tpu.memory_space<vmem>>, vector<2x2x128xf32>
      %c0_66 = arith.constant 0 : index
      %c0_67 = arith.constant 0 : index
      %c0_68 = arith.constant 0 : index
      %132 = vector.load %arg11[%c0_66, %c0_67, %c0_68] : memref<2x2x128xf32, #tpu.memory_space<vmem>>, vector<2x2x128xf32>
      tpu.vector_store %arg11[%c0_66, %c0_67, %c0_68], %131 {strides = array<i32>} : memref<2x2x128xf32, #tpu.memory_space<vmem>>, vector<2x2x128xf32>,
      %c0_69 = arith.constant 0 : index
      %c0_70 = arith.constant 0 : index
      %c0_71 = arith.constant 0 : index
      %133 = vector.load %arg4[%c0_69, %c0_70, %c0_71] : memref<2x2x128xf32, #tpu.memory_space<vmem>>, vector<2x2x128xf32>
      %c0_72 = arith.constant 0 : index
      %c0_73 = arith.constant 0 : index
      %c0_74 = arith.constant 0 : index
      %134 = vector.load %arg12[%c0_72, %c0_73, %c0_74] : memref<2x2x128xf32, #tpu.memory_space<vmem>>, vector<2x2x128xf32>
      tpu.vector_store %arg12[%c0_72, %c0_73, %c0_74], %133 {strides = array<i32>} : memref<2x2x128xf32, #tpu.memory_space<vmem>>, vector<2x2x128xf32>,
      %c0_75 = arith.constant 0 : index
      %c0_76 = arith.constant 0 : index
      %c0_77 = arith.constant 0 : index
      %135 = vector.load %arg2[%c0_75, %c0_76, %c0_77] : memref<1x2x128xf32, #tpu.memory_space<vmem>>, vector<1x2x128xf32>
      %136 = vector.shape_cast %135 : vector<1x2x128xf32> to vector<2x128xf32>
      %c0_78 = arith.constant 0 : index
      %c0_79 = arith.constant 0 : index
      %137 = vector.load %arg13[%c0_78, %c0_79] : memref<2x128xf32, #tpu.memory_space<vmem>>, vector<2x128xf32>
      tpu.vector_store %arg13[%c0_78, %c0_79], %136 {strides = array<i32>} : memref<2x128xf32, #tpu.memory_space<vmem>>, vector<2x128xf32>,
    } else {
    }
    %c0 = arith.constant 0 : index
    %c0_1 = arith.constant 0 : index
    %3 = vector.load %arg13[%c0, %c0_1] : memref<2x128xf32, #tpu.memory_space<vmem>>, vector<2x128xf32>
    %4 = arith.truncf %3 : vector<2x128xf32> to vector<2x128xbf16>
    %c0_2 = arith.constant 0 : index
    %c0_3 = arith.constant 0 : index
    %5 = vector.load %arg5[%c0_2, %c0_3] : memref<128x128xbf16, #tpu.memory_space<vmem>>, vector<128x128xbf16>
    %cst = arith.constant dense<0.000000e+00> : vector<2x128xf32>
    %6 = tpu.matmul %4, %5, %cst {dimension_numbers = #tpu.dot_dimension_numbers<[1], [0], [0], [1], [0, 0, 1, 1], [], []>} : vector<2x128xbf16>, vector<128x128xbf16>, vector<2x128xf32> -> vector<2x128xf32>
    %c0_4 = arith.constant 0 : index
    %c0_5 = arith.constant 0 : index
    %c0_6 = arith.constant 0 : index
    %7 = vector.load %arg11[%c0_4, %c0_5, %c0_6] : memref<2x2x128xf32, #tpu.memory_space<vmem>>, vector<1x2x128xf32>
    %8 = vector.shape_cast %7 : vector<1x2x128xf32> to vector<2x128xf32>
    %c0_7 = arith.constant 0 : index
    %c0_8 = arith.constant 0 : index
    %c0_9 = arith.constant 0 : index
    %9 = vector.load %arg12[%c0_7, %c0_8, %c0_9] : memref<2x2x128xf32, #tpu.memory_space<vmem>>, vector<1x2x128xf32>
    %10 = vector.shape_cast %9 : vector<1x2x128xf32> to vector<2x128xf32>
    %11 = tpu.concatenate %6, %8 in 1 : vector<2x128xf32>, vector<2x128xf32> -> vector<2x256xf32>
    %12 = arith.truncf %11 : vector<2x256xf32> to vector<2x256xbf16>
    %c0_10 = arith.constant 0 : index
    %c0_11 = arith.constant 0 : index
    %c0_12 = arith.constant 0 : index
    %13 = vector.load %arg6[%c0_10, %c0_11, %c0_12] : memref<2x256x512xbf16, #tpu.memory_space<vmem>>, vector<1x256x512xbf16>
    %14 = vector.shape_cast %13 : vector<1x256x512xbf16> to vector<256x512xbf16>
    %cst_13 = arith.constant dense<0.000000e+00> : vector<2x512xf32>
    %15 = tpu.matmul %12, %14, %cst_13 {dimension_numbers = #tpu.dot_dimension_numbers<[1], [0], [0], [1], [0, 0, 1, 1], [], []>} : vector<2x256xbf16>, vector<256x512xbf16>, vector<2x512xf32> -> vector<2x512xf32>
    %c0_14 = arith.constant 0 : index
    %c0_15 = arith.constant 0 : index
    %c0_16 = arith.constant 0 : index
    %16 = vector.load %arg7[%c0_14, %c0_15, %c0_16] : memref<2x1x512xf32, #tpu.memory_space<vmem>>, vector<1x1x512xf32>
    %17 = vector.shape_cast %16 : vector<1x1x512xf32> to vector<1x512xf32>
    %18 = vector.broadcast %17 : vector<1x512xf32> to vector<2x512xf32>
    %19 = arith.addf %15, %18 : vector<2x512xf32>
    %20 = vector.extract_strided_slice %19 {offsets = [0, 0], sizes = [2, 128], strides = [1, 1]} : vector<2x512xf32> to vector<2x128xf32>
    %21 = arith.negf %20 : vector<2x128xf32>
    %22 = math.exp %21 : vector<2x128xf32>
    %cst_17 = arith.constant 1.000000e+00 : f32
    %23 = vector.broadcast %cst_17 : f32 to vector<2x128xf32>
    %24 = arith.addf %23, %22 : vector<2x128xf32>
    %25 = arith.divf %23, %24 : vector<2x128xf32>
    %26 = vector.extract_strided_slice %19 {offsets = [0, 128], sizes = [2, 128], strides = [1, 1]} : vector<2x512xf32> to vector<2x128xf32>
    %27 = arith.negf %26 : vector<2x128xf32>
    %28 = math.exp %27 : vector<2x128xf32>
    %cst_18 = arith.constant 1.000000e+00 : f32
    %29 = vector.broadcast %cst_18 : f32 to vector<2x128xf32>
    %30 = arith.addf %29, %28 : vector<2x128xf32>
    %31 = arith.divf %29, %30 : vector<2x128xf32>
    %32 = vector.extract_strided_slice %19 {offsets = [0, 256], sizes = [2, 128], strides = [1, 1]} : vector<2x512xf32> to vector<2x128xf32>
    %33 = math.tanh %32 : vector<2x128xf32>
    %34 = vector.extract_strided_slice %19 {offsets = [0, 384], sizes = [2, 128], strides = [1, 1]} : vector<2x512xf32> to vector<2x128xf32>
    %35 = arith.negf %34 : vector<2x128xf32>
    %36 = math.exp %35 : vector<2x128xf32>
    %cst_19 = arith.constant 1.000000e+00 : f32
    %37 = vector.broadcast %cst_19 : f32 to vector<2x128xf32>
    %38 = arith.addf %37, %36 : vector<2x128xf32>
    %39 = arith.divf %37, %38 : vector<2x128xf32>
    %40 = arith.mulf %31, %10 : vector<2x128xf32>
    %41 = arith.mulf %25, %33 : vector<2x128xf32>
    %42 = arith.addf %40, %41 : vector<2x128xf32>
    %43 = math.tanh %42 : vector<2x128xf32>
    %44 = arith.mulf %39, %43 : vector<2x128xf32>
    %c0_20 = arith.constant 0 : index
    %c0_21 = arith.constant 0 : index
    %c0_22 = arith.constant 0 : index
    %45 = vector.load %arg11[%c0_20, %c0_21, %c0_22] : memref<2x2x128xf32, #tpu.memory_space<vmem>>, vector<1x2x128xf32>
    %46 = vector.shape_cast %45 : vector<1x2x128xf32> to vector<2x128xf32>
    %47 = vector.shape_cast %44 : vector<2x128xf32> to vector<1x2x128xf32>
    tpu.vector_store %arg11[%c0_20, %c0_21, %c0_22], %47 {strides = array<i32>} : memref<2x2x128xf32, #tpu.memory_space<vmem>>, vector<1x2x128xf32>,
    %c0_23 = arith.constant 0 : index
    %c0_24 = arith.constant 0 : index
    %c0_25 = arith.constant 0 : index
    %48 = vector.load %arg12[%c0_23, %c0_24, %c0_25] : memref<2x2x128xf32, #tpu.memory_space<vmem>>, vector<1x2x128xf32>
    %49 = vector.shape_cast %48 : vector<1x2x128xf32> to vector<2x128xf32>
    %50 = vector.shape_cast %42 : vector<2x128xf32> to vector<1x2x128xf32>
    tpu.vector_store %arg12[%c0_23, %c0_24, %c0_25], %50 {strides = array<i32>} : memref<2x2x128xf32, #tpu.memory_space<vmem>>, vector<1x2x128xf32>,
    %c1 = arith.constant 1 : index
    %c0_26 = arith.constant 0 : index
    %c0_27 = arith.constant 0 : index
    %51 = vector.load %arg11[%c1, %c0_26, %c0_27] : memref<2x2x128xf32, #tpu.memory_space<vmem>>, vector<1x2x128xf32>
    %52 = vector.shape_cast %51 : vector<1x2x128xf32> to vector<2x128xf32>
    %c1_28 = arith.constant 1 : index
    %c0_29 = arith.constant 0 : index
    %c0_30 = arith.constant 0 : index
    %53 = vector.load %arg12[%c1_28, %c0_29, %c0_30] : memref<2x2x128xf32, #tpu.memory_space<vmem>>, vector<1x2x128xf32>
    %54 = vector.shape_cast %53 : vector<1x2x128xf32> to vector<2x128xf32>
    %55 = tpu.concatenate %44, %52 in 1 : vector<2x128xf32>, vector<2x128xf32> -> vector<2x256xf32>
    %56 = arith.truncf %55 : vector<2x256xf32> to vector<2x256xbf16>
    %c1_31 = arith.constant 1 : index
    %c0_32 = arith.constant 0 : index
    %c0_33 = arith.constant 0 : index
    %57 = vector.load %arg6[%c1_31, %c0_32, %c0_33] : memref<2x256x512xbf16, #tpu.memory_space<vmem>>, vector<1x256x512xbf16>
    %58 = vector.shape_cast %57 : vector<1x256x512xbf16> to vector<256x512xbf16>
    %cst_34 = arith.constant dense<0.000000e+00> : vector<2x512xf32>
    %59 = tpu.matmul %56, %58, %cst_34 {dimension_numbers = #tpu.dot_dimension_numbers<[1], [0], [0], [1], [0, 0, 1, 1], [], []>} : vector<2x256xbf16>, vector<256x512xbf16>, vector<2x512xf32> -> vector<2x512xf32>
    %c1_35 = arith.constant 1 : index
    %c0_36 = arith.constant 0 : index
    %c0_37 = arith.constant 0 : index
    %60 = vector.load %arg7[%c1_35, %c0_36, %c0_37] : memref<2x1x512xf32, #tpu.memory_space<vmem>>, vector<1x1x512xf32>
    %61 = vector.shape_cast %60 : vector<1x1x512xf32> to vector<1x512xf32>
    %62 = vector.broadcast %61 : vector<1x512xf32> to vector<2x512xf32>
    %63 = arith.addf %59, %62 : vector<2x512xf32>
    %64 = vector.extract_strided_slice %63 {offsets = [0, 0], sizes = [2, 128], strides = [1, 1]} : vector<2x512xf32> to vector<2x128xf32>
    %65 = arith.negf %64 : vector<2x128xf32>
    %66 = math.exp %65 : vector<2x128xf32>
    %cst_38 = arith.constant 1.000000e+00 : f32
    %67 = vector.broadcast %cst_38 : f32 to vector<2x128xf32>
    %68 = arith.addf %67, %66 : vector<2x128xf32>
    %69 = arith.divf %67, %68 : vector<2x128xf32>
    %70 = vector.extract_strided_slice %63 {offsets = [0, 128], sizes = [2, 128], strides = [1, 1]} : vector<2x512xf32> to vector<2x128xf32>
    %71 = arith.negf %70 : vector<2x128xf32>
    %72 = math.exp %71 : vector<2x128xf32>
    %cst_39 = arith.constant 1.000000e+00 : f32
    %73 = vector.broadcast %cst_39 : f32 to vector<2x128xf32>
    %74 = arith.addf %73, %72 : vector<2x128xf32>
    %75 = arith.divf %73, %74 : vector<2x128xf32>
    %76 = vector.extract_strided_slice %63 {offsets = [0, 256], sizes = [2, 128], strides = [1, 1]} : vector<2x512xf32> to vector<2x128xf32>
    %77 = math.tanh %76 : vector<2x128xf32>
    %78 = vector.extract_strided_slice %63 {offsets = [0, 384], sizes = [2, 128], strides = [1, 1]} : vector<2x512xf32> to vector<2x128xf32>
    %79 = arith.negf %78 : vector<2x128xf32>
    %80 = math.exp %79 : vector<2x128xf32>
    %cst_40 = arith.constant 1.000000e+00 : f32
    %81 = vector.broadcast %cst_40 : f32 to vector<2x128xf32>
    %82 = arith.addf %81, %80 : vector<2x128xf32>
    %83 = arith.divf %81, %82 : vector<2x128xf32>
    %84 = arith.mulf %75, %54 : vector<2x128xf32>
    %85 = arith.mulf %69, %77 : vector<2x128xf32>
    %86 = arith.addf %84, %85 : vector<2x128xf32>
    %87 = math.tanh %86 : vector<2x128xf32>
    %88 = arith.mulf %83, %87 : vector<2x128xf32>
    %c1_41 = arith.constant 1 : index
    %c0_42 = arith.constant 0 : index
    %c0_43 = arith.constant 0 : index
    %89 = vector.load %arg11[%c1_41, %c0_42, %c0_43] : memref<2x2x128xf32, #tpu.memory_space<vmem>>, vector<1x2x128xf32>
    %90 = vector.shape_cast %89 : vector<1x2x128xf32> to vector<2x128xf32>
    %91 = vector.shape_cast %88 : vector<2x128xf32> to vector<1x2x128xf32>
    tpu.vector_store %arg11[%c1_41, %c0_42, %c0_43], %91 {strides = array<i32>} : memref<2x2x128xf32, #tpu.memory_space<vmem>>, vector<1x2x128xf32>,
    %c1_44 = arith.constant 1 : index
    %c0_45 = arith.constant 0 : index
    %c0_46 = arith.constant 0 : index
    %92 = vector.load %arg12[%c1_44, %c0_45, %c0_46] : memref<2x2x128xf32, #tpu.memory_space<vmem>>, vector<1x2x128xf32>
    %93 = vector.shape_cast %92 : vector<1x2x128xf32> to vector<2x128xf32>
    %94 = vector.shape_cast %86 : vector<2x128xf32> to vector<1x2x128xf32>
    tpu.vector_store %arg12[%c1_44, %c0_45, %c0_46], %94 {strides = array<i32>} : memref<2x2x128xf32, #tpu.memory_space<vmem>>, vector<1x2x128xf32>,
    %95 = arith.truncf %88 : vector<2x128xf32> to vector<2x128xbf16>
    %c0_47 = arith.constant 0 : index
    %c0_48 = arith.constant 0 : index
    %96 = vector.load %arg8[%c0_47, %c0_48] : memref<128x128xbf16, #tpu.memory_space<vmem>>, vector<128x128xbf16>
    %cst_49 = arith.constant dense<0.000000e+00> : vector<2x128xf32>
    %97 = tpu.matmul %95, %96, %cst_49 {dimension_numbers = #tpu.dot_dimension_numbers<[1], [0], [0], [1], [0, 0, 1, 1], [], []>} : vector<2x128xbf16>, vector<128x128xbf16>, vector<2x128xf32> -> vector<2x128xf32>
    %c0_50 = arith.constant 0 : index
    %c0_51 = arith.constant 0 : index
    %98 = vector.load %arg9[%c0_50, %c0_51] : memref<1x128xf32, #tpu.memory_space<vmem>>, vector<1x128xf32>
    %99 = vector.broadcast %98 : vector<1x128xf32> to vector<2x128xf32>
    %100 = arith.addf %97, %99 : vector<2x128xf32>
    %c0_52 = arith.constant 0 : index
    %c0_53 = arith.constant 0 : index
    %c0_54 = arith.constant 0 : index
    %101 = vector.load %arg10[%c0_52, %c0_53, %c0_54] : memref<1x2x128xf32, #tpu.memory_space<vmem>>, vector<1x2x128xf32>
    %102 = vector.shape_cast %101 : vector<1x2x128xf32> to vector<2x128xf32>
    %103 = vector.shape_cast %100 : vector<2x128xf32> to vector<1x2x128xf32>
    tpu.vector_store %arg10[%c0_52, %c0_53, %c0_54], %103 {strides = array<i32>} : memref<1x2x128xf32, #tpu.memory_space<vmem>>, vector<1x2x128xf32>,
    %104 = tpu.iota {dimensions = array<i32: 1>} : vector<2x128xi32>
    %cst_55 = arith.constant dense<0xFF800000> : vector<2xf32>
    %105 = vector.multi_reduction <maximumf>, %100, %cst_55 [1] : vector<2x128xf32> to vector<2xf32>
    %106 = vector.shape_cast %105 : vector<2xf32> to vector<2x1xf32>
    %107 = vector.broadcast %106 : vector<2x1xf32> to vector<2x128xf32>
    %108 = arith.cmpf oeq, %100, %107 : vector<2x128xf32>
    %c128_i32 = arith.constant 128 : i32
    %109 = vector.broadcast %c128_i32 : i32 to vector<2x128xi32>
    %110 = arith.select %108, %104, %109 : vector<2x128xi1>, vector<2x128xi32>
    %cst_56 = arith.constant dense<2147483647> : vector<2xi32>
    %111 = vector.multi_reduction <minsi>, %110, %cst_56 [1] : vector<2x128xi32> to vector<2xi32>
    %112 = vector.shape_cast %111 : vector<2xi32> to vector<2x1xi32>
    %113 = vector.broadcast %112 : vector<2x1xi32> to vector<2x128xi32>
    %114 = arith.cmpi eq, %104, %113 : vector<2x128xi32>
    %115 = arith.extui %114 : vector<2x128xi1> to vector<2x128xi32>
    %116 = arith.sitofp %115 : vector<2x128xi32> to vector<2x128xf32>
    %117 = arith.index_cast %arg0 : i32 to index
    %118 = memref.load %arg1[%117] : memref<8xi32, #tpu.memory_space<smem>>
    %c1_i32 = arith.constant 1 : i32
    %119 = arith.cmpi eq, %118, %c1_i32 : i32
    %120 = arith.extui %119 : i1 to i32
    %121 = arith.sitofp %120 : i32 to f32
    %c0_57 = arith.constant 0 : index
    %c0_58 = arith.constant 0 : index
    %c0_59 = arith.constant 0 : index
    %122 = vector.load %arg2[%c0_57, %c0_58, %c0_59] : memref<1x2x128xf32, #tpu.memory_space<vmem>>, vector<1x2x128xf32>
    %123 = vector.shape_cast %122 : vector<1x2x128xf32> to vector<2x128xf32>
    %124 = vector.broadcast %121 : f32 to vector<2x128xf32>
    %125 = arith.mulf %124, %123 : vector<2x128xf32>
    %cst_60 = arith.constant 1.000000e+00 : f32
    %126 = arith.subf %cst_60, %121 : f32
    %127 = vector.broadcast %126 : f32 to vector<2x128xf32>
    %128 = arith.mulf %127, %116 : vector<2x128xf32>
    %129 = arith.addf %125, %128 : vector<2x128xf32>
    %c0_61 = arith.constant 0 : index
    %c0_62 = arith.constant 0 : index
    %130 = vector.load %arg13[%c0_61, %c0_62] : memref<2x128xf32, #tpu.memory_space<vmem>>, vector<2x128xf32>
    tpu.vector_store %arg13[%c0_61, %c0_62], %129 {strides = array<i32>} : memref<2x128xf32, #tpu.memory_space<vmem>>, vector<2x128xf32>,
    return
  }
  func.func @transform_0(%arg0: i32, %arg1: memref<8xi32, #tpu.memory_space<smem>>) -> (i32, i32, i32) {
    %c0_i32 = arith.constant 0 : i32
    %c0_i32_0 = arith.constant 0 : i32
    %c0_i32_1 = arith.constant 0 : i32
    return %arg0, %c0_i32, %c0_i32_0 : i32, i32, i32
  }
  func.func @transform_1(%arg0: i32, %arg1: memref<8xi32, #tpu.memory_space<smem>>) -> (i32, i32, i32) {
    %c0_i32 = arith.constant 0 : i32
    %c0_i32_0 = arith.constant 0 : i32
    %c0_i32_1 = arith.constant 0 : i32
    %c0_i32_2 = arith.constant 0 : i32
    return %c0_i32, %c0_i32_0, %c0_i32_1 : i32, i32, i32
  }
  func.func @transform_2(%arg0: i32, %arg1: memref<8xi32, #tpu.memory_space<smem>>) -> (i32, i32, i32) {
    %c0_i32 = arith.constant 0 : i32
    %c0_i32_0 = arith.constant 0 : i32
    %c0_i32_1 = arith.constant 0 : i32
    %c0_i32_2 = arith.constant 0 : i32
    return %c0_i32, %c0_i32_0, %c0_i32_1 : i32, i32, i32
  }
  func.func @transform_3(%arg0: i32, %arg1: memref<8xi32, #tpu.memory_space<smem>>) -> (i32, i32) {
    %c0_i32 = arith.constant 0 : i32
    %c0_i32_0 = arith.constant 0 : i32
    %c0_i32_1 = arith.constant 0 : i32
    return %c0_i32, %c0_i32_0 : i32, i32
  }
  func.func @transform_4(%arg0: i32, %arg1: memref<8xi32, #tpu.memory_space<smem>>) -> (i32, i32, i32) {
    %c0_i32 = arith.constant 0 : i32
    %c0_i32_0 = arith.constant 0 : i32
    %c0_i32_1 = arith.constant 0 : i32
    %c0_i32_2 = arith.constant 0 : i32
    return %c0_i32, %c0_i32_0, %c0_i32_1 : i32, i32, i32
  }
  func.func @transform_5(%arg0: i32, %arg1: memref<8xi32, #tpu.memory_space<smem>>) -> (i32, i32, i32) {
    %c0_i32 = arith.constant 0 : i32
    %c0_i32_0 = arith.constant 0 : i32
    %c0_i32_1 = arith.constant 0 : i32
    %c0_i32_2 = arith.constant 0 : i32
    return %c0_i32, %c0_i32_0, %c0_i32_1 : i32, i32, i32
  }
  func.func @transform_6(%arg0: i32, %arg1: memref<8xi32, #tpu.memory_space<smem>>) -> (i32, i32) {
    %c0_i32 = arith.constant 0 : i32
    %c0_i32_0 = arith.constant 0 : i32
    %c0_i32_1 = arith.constant 0 : i32
    return %c0_i32, %c0_i32_0 : i32, i32
  }
  func.func @transform_7(%arg0: i32, %arg1: memref<8xi32, #tpu.memory_space<smem>>) -> (i32, i32) {
    %c0_i32 = arith.constant 0 : i32
    %c0_i32_0 = arith.constant 0 : i32
    %c0_i32_1 = arith.constant 0 : i32
    return %c0_i32, %c0_i32_0 : i32, i32
  }
  func.func @transform_8(%arg0: i32, %arg1: memref<8xi32, #tpu.memory_space<smem>>) -> (i32, i32, i32) {
    %c0_i32 = arith.constant 0 : i32
    %c0_i32_0 = arith.constant 0 : i32
    %c0_i32_1 = arith.constant 0 : i32
    return %arg0, %c0_i32, %c0_i32_0 : i32, i32, i32
  }
}

</mosaic_0001>

<bundles_post_ra>
// kernel: seq2seq_forward.2
= control target key start
LH: loop header
LB: loop body
LE: loop exit
PB: predicated region body
PF: predicated region fallthrough
CT: control target
= control target key end

     0   :  { %10 = vsyncpa [#allocation5], 0  ;;  %s1755_s15 = smov 0   ;;  %s1821_s0 = inlined_call_operand.vmem [shape: bf16[8,2,128], index: 0, kind: input, shape index: {}]   ;;  %s1822_s1 = inlined_call_operand.hbm [shape: bf16[2,256,512], index: 1, kind: input, shape index: {}]   ;;  %s1823_s2 = inlined_call_operand.vmem [shape: f32[2,1,512], index: 2, kind: input, shape index: {}]   ;;  %s1824_s3 = inlined_call_operand.vmem [shape: f32[2,2,128], index: 3, kind: output, shape index: {0}]   ;;  %s1825_s4 = inlined_call_operand.vmem [shape: f32[2,2,128], index: 4, kind: output, shape index: {1}]  }
   0x1 LB: > { %s1761_s16 = sadd.s32 4294967295, %s1724_s15   ;;  %p1296_p0 = scmp.ge.s32.totalorder %s1724_s15, 1  ;;  %s1724_s15 = sphi %s1755_s15, %s16_s15  }
   0x2   : > { %p131_p1 = scmp.lt.s32.totalorder %s1724_s15, 9  ;;  %s1726_s17 = smov [#allocation4]  }
   0x3   : > { %s143_s18 = sshll.u32 %s1726_s17, 4  ;;  %p1449_p4 = scmp.eq.s32.totalorder %s1761_s16, 0  ;;  %s144_s18 = int_to_ptr.vmem [resolvable:$true] %s143_s18 }
   0x4   : > { %p1766_p3 = pnand %p1296_p0, %p131_p1  ;;  %s1699_s20 = scalar_lea.vmem %s144_s18, 16384 }
   0x5   : > { %p1700_p8 = scmp.ne.s32.totalorder %s144_s18, %s1699_s20  ;;  %p1707_p11 = scmp.lt.s32.totalorder %s144_s18, %s144_s18 }
   0x6   : > { %p1445_p5 = pneg %p1766_p3  ;;  %p1708_p12 = scmp.lt.s32.totalorder %s1699_s20, %s1699_s20 }
   0x8   : > { %p1446_p6 = pnand %p1449_p4, %p1445_p5  ;;  %p1709_p13 = por %p1708_p12, %p1707_p11 }
   0xa   : > { %p1690_p7 = pneg %p1446_p6 }
   0xc   : > { %p1702_p9 = pnand %p1700_p8, %p1690_p7 }
   0xe   : > { %p1703_p10 = pneg %p1702_p9 }
  0x10   : > { %p1710_p2 = pnand %p1709_p13, %p1703_p10 }
  0x12   : > { %1713 = shalt.err (!%p1710_p2)
}
  0x13   : > { %s1727_s21 = smov 256   ;;  %s1728_s22 = smov 16  }
  0x14   : > { %1448 = dma.hbm_to_vmem [thread:$0]  (!%p1446_p6), %s1822_s1, 16384, %s144_s18, [#allocation5], %s1727_s21, %s1727_s21, %s1728_s22  }
  0x15   : > { %168 = sbr.rel (%p1766_p3) target bundleno = 612 (0x264), region = 32 }
  0x1a   : > { %1719 = dma.done.wait (%p1449_p4), [#allocation5], 16384  }
  0x1b   : > { %1721 = vsyncadd (%p1449_p4), [#allocation5], 4294950912  ;;  %p187_p0 = scmp.lt.s32.totalorder %s1761_s16, 7  ;;  %p1827_p1 = scmp.ne.s32.totalorder %s1761_s16, 0 }
  0x1d   : > { %s1786_s25 = scalar_select %p187_p0, %s1761_s16, 7 }
  0x1e   : > { %193 = sbr.rel (%p1827_p1) target bundleno = 38 (0x26), region = 40 }
  0x1f   : > { %s189_s28 = scalar_lea.vmem %s1821_s0, %s1786_s25 }
  0x23   : > { %v1729_v0 = vmov 0.0  }
  0x24   : > { %194 = vst [vmem:[#allocation2] sm:$0x3] %v1729_v0  ;;  %195 = vst [vmem:[#allocation2 + $0x2] sm:$0x3] %v1729_v0 }
  0x25   : > { %196 = vst [vmem:[#allocation3] sm:$0x3] %v1729_v0  ;;  %197 = vst [vmem:[#allocation3 + $0x2] sm:$0x3] %v1729_v0 }
  0x26 PF: > { %v1463_v1 = vld [vmem:[#allocation4 + $0xe4] ss:$16 sps:$4 sm:$0xff]   ;;  %v1465_v2 = vld [vmem:[#allocation4 + $0xe0] ss:$16 sps:$4 sm:$0xff]   ;;  %v1474_v6 = vld [vmem:[#allocation4 + $0xec] ss:$16 sps:$4 sm:$0xff]  }
  0x27   : > { %610 = vmatprep.subr.bf16.mxu0 %v1463_v1  ;;  %v1466_v3 = vld [vmem:[#allocation4 + $0xc4] ss:$16 sps:$4 sm:$0xff]   ;;  %v1468_v4 = vld [vmem:[#allocation4 + $0xc0] ss:$16 sps:$4 sm:$0xff]   ;;  %v1477_v7 = vld [vmem:[#allocation4 + $0xe8] ss:$16 sps:$4 sm:$0xff]   ;;  %651 = vmatprep.subr.bf16.mxu1 %v1474_v6 }
  0x28   : > { %611 = vmatpush1.bf16.msra.mxu0 %v1465_v2  ;;  %v1469_v5 = vld [vmem:[#allocation4 + $0xa4] ss:$16 sps:$4 sm:$0xff]   ;;  %v1471_v8 = vld [vmem:[#allocation4 + $0xa0] ss:$16 sps:$4 sm:$0xff]   ;;  %652 = vmatpush1.bf16.msra.mxu1 %v1477_v7  ;;  %v1480_v10 = vld [vmem:[#allocation4 + $0xcc] ss:$16 sps:$4 sm:$0xff]  }
  0x29   : > { %612 = vmatprep.subr.bf16.mxu0 %v1466_v3  ;;  %v1472_v9 = vld [vmem:[#allocation4 + $0x84] ss:$16 sps:$4 sm:$0xff]   ;;  %v1483_v11 = vld [vmem:[#allocation4 + $0xc8] ss:$16 sps:$4 sm:$0xff]   ;;  %653 = vmatprep.subr.bf16.mxu1 %v1480_v10  ;;  %v1476_v12 = vld [vmem:[#allocation4 + $0x80] ss:$16 sps:$4 sm:$0xff]  }
  0x2a   : > { %v1478_v13 = vld [vmem:[#allocation4 + $0x64] ss:$16 sps:$4 sm:$0xff]   ;;  %v1486_v14 = vld [vmem:[#allocation4 + $0xac] ss:$16 sps:$4 sm:$0xff]   ;;  %v1489_v15 = vld [vmem:[#allocation4 + $0xa8] ss:$16 sps:$4 sm:$0xff]  }
  0x2b   : > { %v1492_v16 = vld [vmem:[#allocation4 + $0x8c] ss:$16 sps:$4 sm:$0xff]   ;;  %v1482_v17 = vld [vmem:[#allocation4 + $0x60] ss:$16 sps:$4 sm:$0xff]   ;;  %v1484_v18 = vld [vmem:[#allocation4 + $0x44] ss:$16 sps:$4 sm:$0xff]  }
  0x2c   : > { %613 = vmatpush1.bf16.msra.mxu0 %v1468_v4  ;;  %654 = vmatpush1.bf16.msra.mxu1 %v1483_v11  ;;  %v1495_v19 = vld [vmem:[#allocation4 + $0x88] ss:$16 sps:$4 sm:$0xff]   ;;  %v1498_v20 = vld [vmem:[#allocation4 + $0x6c] ss:$16 sps:$4 sm:$0xff]   ;;  %v1488_v21 = vld [vmem:[#allocation4 + $0x40] ss:$16 sps:$4 sm:$0xff]  }
  0x2d   : > { %614 = vmatprep.subr.bf16.mxu0 %v1469_v5  ;;  %655 = vmatprep.subr.bf16.mxu1 %v1486_v14  ;;  %v1490_v22 = vld [vmem:[#allocation4 + $0x24] ss:$16 sps:$4 sm:$0xff]   ;;  %v1501_v23 = vld [vmem:[#allocation4 + $0x68] ss:$16 sps:$4 sm:$0xff]   ;;  %v1504_v24 = vld [vmem:[#allocation4 + $0x4c] ss:$16 sps:$4 sm:$0xff]  }
  0x2e   : > { %v1494_v25 = vld [vmem:[#allocation4 + $0x20] ss:$16 sps:$4 sm:$0xff]   ;;  %v1496_v26 = vld [vmem:[#allocation4 + $0x4] ss:$16 sps:$4 sm:$0xff]   ;;  %v1507_v27 = vld [vmem:[#allocation4 + $0x48] ss:$16 sps:$4 sm:$0xff]  }
  0x2f   : > { %v1510_v28 = vld [vmem:[#allocation4 + $0x2c] ss:$16 sps:$4 sm:$0xff]   ;;  %v1500_v29 = vld [vmem:[#allocation4] ss:$16 sps:$4 sm:$0xff]   ;;  %v1502_v30 = vld [vmem:[#allocation4 + $0x1e4] ss:$16 sps:$4 sm:$0xff]  }
  0x30   : > { %615 = vmatpush1.bf16.msra.mxu0 %v1471_v8  ;;  %656 = vmatpush1.bf16.msra.mxu1 %v1489_v15  ;;  %v1513_v31 = vld [vmem:[#allocation4 + $0x28] ss:$16 sps:$4 sm:$0xff]   ;;  %v1516_v32 = vld [vmem:[#allocation4 + $0xc] ss:$16 sps:$4 sm:$0xff]   ;;  %v1506_v33 = vld [vmem:[#allocation4 + $0x1e0] ss:$16 sps:$4 sm:$0xff]  }
  0x31   : > { %616 = vmatprep.subr.bf16.mxu0 %v1472_v9  ;;  %657 = vmatprep.subr.bf16.mxu1 %v1492_v16  ;;  %v1508_v34 = vld [vmem:[#allocation4 + $0x1c4] ss:$16 sps:$4 sm:$0xff]   ;;  %v1519_v35 = vld [vmem:[#allocation4 + $0x8] ss:$16 sps:$4 sm:$0xff]   ;;  %v1522_v36 = vld [vmem:[#allocation4 + $0x1ec] ss:$16 sps:$4 sm:$0xff]  }
  0x32   : > { %v1512_v37 = vld [vmem:[#allocation4 + $0x1c0] ss:$16 sps:$4 sm:$0xff]   ;;  %v1514_v38 = vld [vmem:[#allocation4 + $0x1a4] ss:$16 sps:$4 sm:$0xff]   ;;  %v1525_v39 = vld [vmem:[#allocation4 + $0x1e8] ss:$16 sps:$4 sm:$0xff]  }
  0x33   : > { %v1528_v40 = vld [vmem:[#allocation4 + $0x1cc] ss:$16 sps:$4 sm:$0xff]   ;;  %v200_v41 = vld [vmem:[#allocation2] sm:$0x3]  ;;  %v1518_v42 = vld [vmem:[#allocation4 + $0x1a0] ss:$16 sps:$4 sm:$0xff]  }
  0x34   : > { %617 = vmatpush1.bf16.msra.mxu0 %v1476_v12  ;;  %658 = vmatpush1.bf16.msra.mxu1 %v1495_v19  ;;  %v203_v43 = vpack.c.bf16 %v200_v41, %v200_v41  ;;  %v1520_v44 = vld [vmem:[#allocation4 + $0x184] ss:$16 sps:$4 sm:$0xff]   ;;  %v1531_v45 = vld [vmem:[#allocation4 + $0x1c8] ss:$16 sps:$4 sm:$0xff]   ;;  %v1534_v46 = vld [vmem:[#allocation4 + $0x1ac] ss:$16 sps:$4 sm:$0xff]  }
  0x35   : > { %618 = vmatprep.subr.bf16.mxu0 %v1478_v13  ;;  %659 = vmatprep.subr.bf16.mxu1 %v1498_v20  ;;  %v1524_v47 = vld [vmem:[#allocation4 + $0x180] ss:$16 sps:$4 sm:$0xff]   ;;  %v1526_v48 = vld [vmem:[#allocation4 + $0x164] ss:$16 sps:$4 sm:$0xff]   ;;  %v1537_v49 = vld [vmem:[#allocation4 + $0x1a8] ss:$16 sps:$4 sm:$0xff]  }
  0x36   : > { %642 = vmatprep.mubr.bf16.mxu0 %v203_v43  ;;  %683 = vmatprep.mubr.bf16.mxu1 %v203_v43  ;;  %v1540_v50 = vld [vmem:[#allocation4 + $0x18c] ss:$16 sps:$4 sm:$0xff]   ;;  %v1530_v51 = vld [vmem:[#allocation4 + $0x160] ss:$16 sps:$4 sm:$0xff]   ;;  %v1532_v52 = vld [vmem:[#allocation4 + $0x144] ss:$16 sps:$4 sm:$0xff]  }
  0x37   : > { %v1543_v53 = vld [vmem:[#allocation4 + $0x188] ss:$16 sps:$4 sm:$0xff]   ;;  %v1536_v54 = vld [vmem:[#allocation4 + $0x140] ss:$16 sps:$4 sm:$0xff]   ;;  %v1546_v55 = vld [vmem:[#allocation4 + $0x16c] ss:$16 sps:$4 sm:$0xff]  }
  0x38   : > { %619 = vmatpush1.bf16.msra.mxu0 %v1482_v17  ;;  %660 = vmatpush1.bf16.msra.mxu1 %v1501_v23  ;;  %v1538_v56 = vld [vmem:[#allocation4 + $0x124] ss:$16 sps:$4 sm:$0xff]   ;;  %v1549_v57 = vld [vmem:[#allocation4 + $0x168] ss:$16 sps:$4 sm:$0xff]   ;;  %v1551_v58 = vld [vmem:[#allocation4 + $0x14c] ss:$16 sps:$4 sm:$0xff]  }
  0x39   : > { %620 = vmatprep.subr.bf16.mxu0 %v1484_v18  ;;  %661 = vmatprep.subr.bf16.mxu1 %v1504_v24  ;;  %v1542_v59 = vld [vmem:[#allocation4 + $0x120] ss:$16 sps:$4 sm:$0xff]   ;;  %v1544_v60 = vld [vmem:[#allocation4 + $0x104] ss:$16 sps:$4 sm:$0xff]   ;;  %v1553_v61 = vld [vmem:[#allocation4 + $0x148] ss:$16 sps:$4 sm:$0xff]  }
  0x3a   : > { %v1554_v62 = vld [vmem:[#allocation4 + $0x12c] ss:$16 sps:$4 sm:$0xff]   ;;  %v1548_v63 = vld [vmem:[#allocation4 + $0x100] ss:$16 sps:$4 sm:$0xff]   ;;  %v1556_v0 = vld [vmem:[#allocation4 + $0x128] ss:$16 sps:$4 sm:$0xff]  }
  0x3b   : > { %v1562_v1 = vld [vmem:[#allocation4 + $0x2e4] ss:$16 sps:$4 sm:$0xff]   ;;  %v1557_v2 = vld [vmem:[#allocation4 + $0x10c] ss:$16 sps:$4 sm:$0xff]   ;;  %v1560_v4 = vld [vmem:[#allocation4 + $0x2e0] ss:$16 sps:$4 sm:$0xff]  }
  0x3c   : > { %621 = vmatpush1.bf16.msra.mxu0 %v1488_v21  ;;  %662 = vmatpush1.bf16.msra.mxu1 %v1507_v27  ;;  %v1550_v3 = vld [vmem:[%s189_s28] ss:$0 sps:$4 sm:$0x11]   ;;  %v1568_v6 = vld [vmem:[#allocation4 + $0x2c4] ss:$16 sps:$4 sm:$0xff]   ;;  %p1438_p2 = scmp.ne.s32.totalorder %s1761_s16, 7 }
  0x3d   : > { %622 = vmatprep.subr.bf16.mxu0 %v1490_v22  ;;  %663 = vmatprep.subr.bf16.mxu1 %v1510_v28  ;;  %v1559_v5 = vld [vmem:[#allocation4 + $0x108] ss:$16 sps:$4 sm:$0xff]   ;;  %v1565_v7 = vld [vmem:[#allocation4 + $0x2ec] ss:$16 sps:$4 sm:$0xff]   ;;  %v1566_v8 = vld [vmem:[#allocation4 + $0x2c0] ss:$16 sps:$4 sm:$0xff]  }
  0x3e   : > { %v1563_v9 = vld [vmem:[#allocation4 + $0x2e8] ss:$16 sps:$4 sm:$0xff]   ;;  %v1571_v10 = vld [vmem:[#allocation4 + $0x2cc] ss:$16 sps:$4 sm:$0xff]   ;;  %v1574_v12 = vld [vmem:[#allocation4 + $0x2a4] ss:$16 sps:$4 sm:$0xff]  }
  0x3f   : > { %v1569_v11 = vld [vmem:[#allocation4 + $0x2c8] ss:$16 sps:$4 sm:$0xff]   ;;  %v1577_v13 = vld [vmem:[#allocation4 + $0x2ac] ss:$16 sps:$4 sm:$0xff]   ;;  %v1572_v14 = vld [vmem:[#allocation4 + $0x2a0] ss:$16 sps:$4 sm:$0xff]  }
  0x40   : > { %623 = vmatpush1.bf16.msra.mxu0 %v1494_v25  ;;  %664 = vmatpush1.bf16.msra.mxu1 %v1513_v31  ;;  %v1575_v15 = vld [vmem:[#allocation4 + $0x2a8] ss:$16 sps:$4 sm:$0xff]   ;;  %v1580_v16 = vld [vmem:[#allocation4 + $0x284] ss:$16 sps:$4 sm:$0xff]   ;;  %v1583_v17 = vld [vmem:[#allocation4 + $0x28c] ss:$16 sps:$4 sm:$0xff]  }
  0x41   : > { %624 = vmatprep.subr.bf16.mxu0 %v1496_v26  ;;  %665 = vmatprep.subr.bf16.mxu1 %v1516_v32  ;;  %v1578_v18 = vld [vmem:[#allocation4 + $0x280] ss:$16 sps:$4 sm:$0xff]   ;;  %v1581_v19 = vld [vmem:[#allocation4 + $0x288] ss:$16 sps:$4 sm:$0xff]   ;;  %v1586_v20 = vld [vmem:[#allocation4 + $0x264] ss:$16 sps:$4 sm:$0xff]  }
  0x42   : > { %v1589_v21 = vld [vmem:[#allocation4 + $0x26c] ss:$16 sps:$4 sm:$0xff]   ;;  %v1584_v22 = vld [vmem:[#allocation4 + $0x260] ss:$16 sps:$4 sm:$0xff]   ;;  %v1587_v23 = vld [vmem:[#allocation4 + $0x268] ss:$16 sps:$4 sm:$0xff]  }
  0x43   : > { %v1592_v24 = vld [vmem:[#allocation4 + $0x244] ss:$16 sps:$4 sm:$0xff]   ;;  %v1595_v25 = vld [vmem:[#allocation4 + $0x24c] ss:$16 sps:$4 sm:$0xff]   ;;  %v1590_v26 = vld [vmem:[#allocation4 + $0x240] ss:$16 sps:$4 sm:$0xff]  }
  0x44   : > { %625 = vmatpush1.bf16.msra.mxu0 %v1500_v29  ;;  %666 = vmatpush1.bf16.msra.mxu1 %v1519_v35  ;;  %v1593_v27 = vld [vmem:[#allocation4 + $0x248] ss:$16 sps:$4 sm:$0xff]   ;;  %v1598_v28 = vld [vmem:[#allocation4 + $0x224] ss:$16 sps:$4 sm:$0xff]   ;;  %v1601_v29 = vld [vmem:[#allocation4 + $0x22c] ss:$16 sps:$4 sm:$0xff]  }
  0x45   : > { %626 = vmatprep.subr.bf16.mxu0 %v1502_v30  ;;  %667 = vmatprep.subr.bf16.mxu1 %v1522_v36  ;;  %v1596_v30 = vld [vmem:[#allocation4 + $0x220] ss:$16 sps:$4 sm:$0xff]   ;;  %v1599_v31 = vld [vmem:[#allocation4 + $0x228] ss:$16 sps:$4 sm:$0xff]   ;;  %v1604_v32 = vld [vmem:[#allocation4 + $0x204] ss:$16 sps:$4 sm:$0xff]  }
  0x46   : > { %v1605_v35 = vld [vmem:[#allocation4 + $0x208] ss:$16 sps:$4 sm:$0xff]   ;;  %v1610_v36 = vld [vmem:[#allocation4 + $0x3e4] ss:$16 sps:$4 sm:$0xff]   ;;  %v1619_v41 = vld [vmem:[#allocation4 + $0x3cc] ss:$16 sps:$4 sm:$0xff]  }
  0x47   : > { %v1617_v43 = vld [vmem:[#allocation4 + $0x3c8] ss:$16 sps:$4 sm:$0xff]  }
  0x48   : > { %627 = vmatpush2.bf16.msra.mxu0 %v1506_v33  ;;  %668 = vmatpush2.bf16.msra.mxu1 %v1525_v39  ;;  %v1607_v33 = vld [vmem:[#allocation4 + $0x20c] ss:$16 sps:$4 sm:$0xff]   ;;  %v1611_v39 = vld [vmem:[#allocation4 + $0x3e8] ss:$16 sps:$4 sm:$0xff]  }
  0x49   : > { %628 = vmatprep.subr.bf16.mxu0 %v1508_v34  ;;  %669 = vmatprep.subr.bf16.mxu1 %v1528_v40  ;;  %v1602_v34 = vld [vmem:[#allocation4 + $0x200] ss:$16 sps:$4 sm:$0xff]   ;;  %v1616_v40 = vld [vmem:[#allocation4 + $0x3c4] ss:$16 sps:$4 sm:$0xff]  }
  0x4c   : > { %629 = vmatpush2.bf16.msra.mxu0 %v1512_v37  ;;  %670 = vmatpush2.bf16.msra.mxu1 %v1531_v45  ;;  %v1613_v37 = vld [vmem:[#allocation4 + $0x3ec] ss:$16 sps:$4 sm:$0xff]  }
  0x4d   : > { %630 = vmatprep.subr.bf16.mxu0 %v1514_v38  ;;  %671 = vmatprep.subr.bf16.mxu1 %v1534_v46  ;;  %v1608_v38 = vld [vmem:[#allocation4 + $0x3e0] ss:$16 sps:$4 sm:$0xff]   ;;  %v1625_v45 = vld [vmem:[#allocation4 + $0x3ac] ss:$16 sps:$4 sm:$0xff]  }
  0x4e   : > { %v1620_v46 = vld [vmem:[#allocation4 + $0x3a0] ss:$16 sps:$4 sm:$0xff]  }
  0x50   : > { %631 = vmatpush2.bf16.msra.mxu0 %v1518_v42  ;;  %672 = vmatpush2.bf16.msra.mxu1 %v1537_v49  ;;  %v1614_v42 = vld [vmem:[#allocation4 + $0x3c0] ss:$16 sps:$4 sm:$0xff]   ;;  %v1631_v49 = vld [vmem:[#allocation4 + $0x38c] ss:$16 sps:$4 sm:$0xff]  }
  0x51   : > { %632 = vmatprep.subr.bf16.mxu0 %v1520_v44  ;;  %673 = vmatprep.subr.bf16.mxu1 %v1540_v50  ;;  %v1622_v44 = vld [vmem:[#allocation4 + $0x3a4] ss:$16 sps:$4 sm:$0xff]   ;;  %v1626_v50 = vld [vmem:[#allocation4 + $0x380] ss:$16 sps:$4 sm:$0xff]  }
  0x54   : > { %633 = vmatpush2.bf16.msra.mxu0 %v1524_v47  ;;  %674 = vmatpush2.bf16.msra.mxu1 %v1543_v53  ;;  %v1623_v47 = vld [vmem:[#allocation4 + $0x3a8] ss:$16 sps:$4 sm:$0xff]   ;;  %v1634_v53 = vld [vmem:[#allocation4 + $0x364] ss:$16 sps:$4 sm:$0xff]  }
  0x55   : > { %634 = vmatprep.subr.bf16.mxu0 %v1526_v48  ;;  %675 = vmatprep.subr.bf16.mxu1 %v1546_v55  ;;  %v1628_v48 = vld [vmem:[#allocation4 + $0x384] ss:$16 sps:$4 sm:$0xff]   ;;  %v1637_v55 = vld [vmem:[#allocation4 + $0x36c] ss:$16 sps:$4 sm:$0xff]  }
  0x58   : > { %635 = vmatpush2.bf16.msra.mxu0 %v1530_v51  ;;  %676 = vmatpush2.bf16.msra.mxu1 %v1549_v57  ;;  %v1629_v51 = vld [vmem:[#allocation4 + $0x388] ss:$16 sps:$4 sm:$0xff]   ;;  %v1643_v57 = vld [vmem:[#allocation4 + $0x34c] ss:$16 sps:$4 sm:$0xff]  }
  0x59   : > { %636 = vmatprep.subr.bf16.mxu0 %v1532_v52  ;;  %677 = vmatprep.subr.bf16.mxu1 %v1551_v58  ;;  %v1632_v52 = vld [vmem:[#allocation4 + $0x360] ss:$16 sps:$4 sm:$0xff]  }
  0x5a   : > { %v1638_v58 = vld [vmem:[#allocation4 + $0x340] ss:$16 sps:$4 sm:$0xff]  }
  0x5c   : > { %637 = vmatpush2.bf16.msra.mxu0 %v1536_v54  ;;  %678 = vmatpush2.bf16.msra.mxu1 %v1553_v61  ;;  %v1635_v54 = vld [vmem:[#allocation4 + $0x368] ss:$16 sps:$4 sm:$0xff]   ;;  %v1649_v61 = vld [vmem:[#allocation4 + $0x32c] ss:$16 sps:$4 sm:$0xff]  }
  0x5d   : > { %638 = vmatprep.subr.bf16.mxu0 %v1538_v56  ;;  %679 = vmatprep.subr.bf16.mxu1 %v1554_v62  ;;  %v1640_v56 = vld [vmem:[#allocation4 + $0x344] ss:$16 sps:$4 sm:$0xff]   ;;  %v719_v62 = vld [vmem:[#allocation2 + $0x2] sm:$0x3] }
  0x60   : > { %639 = vmatpush2.bf16.msra.mxu0 %v1542_v59  ;;  %680 = vmatpush2.bf16.msra.mxu1 %v1556_v0  ;;  %v1641_v59 = vld [vmem:[#allocation4 + $0x348] ss:$16 sps:$4 sm:$0xff]   ;;  %v1644_v0 = vld [vmem:[#allocation4 + $0x320] ss:$16 sps:$4 sm:$0xff]  }
  0x61   : > { %640 = vmatprep.subr.bf16.mxu0 %v1544_v60  ;;  %681 = vmatprep.subr.bf16.mxu1 %v1557_v2  ;;  %v1646_v60 = vld [vmem:[#allocation4 + $0x324] ss:$16 sps:$4 sm:$0xff]  }
  0x62   : > { %v1652_v2 = vld [vmem:[#allocation4 + $0x304] ss:$16 sps:$4 sm:$0xff]  }
  0x64   : > { %641 = vmatpush2.bf16.msra.mxu0 %v1548_v63  ;;  %682 = vmatpush2.bf16.msra.mxu1 %v1559_v5  ;;  %v723_v63 = vpack.c.bf16 %v719_v62, %v719_v62  ;;  %v1653_v5 = vld [vmem:[#allocation4 + $0x308] ss:$16 sps:$4 sm:$0xff]  }
  0x65   : > { %1132 = vmatprep.subr.bf16.mxu0 %v1562_v1  ;;  %1173 = vmatprep.subr.bf16.mxu1 %v1565_v7  ;;  %v1647_v1 = vld [vmem:[#allocation4 + $0x328] ss:$16 sps:$4 sm:$0xff]  }
  0x67   : > { %643 = vmatmul.mubr.bf16.vlgmr.msra.gmra.mxu0 %v1550_v3  ;;  %684 = vmatmul.mubr.bf16.vlgmr.msra.gmra.mxu1 %v1550_v3  ;;  %v1655_v3 = vld [vmem:[#allocation4 + $0x30c] ss:$16 sps:$4 sm:$0xff]  }
  0x68   : > { %1133 = vmatpush1.bf16.msra.mxu0 %v1560_v4  ;;  %1174 = vmatpush1.bf16.msra.mxu1 %v1563_v9  ;;  %v1650_v4 = vld [vmem:[#allocation4 + $0x300] ss:$16 sps:$4 sm:$0xff]   ;;  %v268_v9 = vld [vmem:[%s1823_s2] sm:$0xf] }
  0x69   : > { %1134 = vmatprep.subr.bf16.mxu0 %v1568_v6  ;;  %1175 = vmatprep.subr.bf16.mxu1 %v1571_v10  ;;  %v270_v6 = vlaneseq }
  0x6a   : > { %1164 = vmatprep.mubr.bf16.mxu0 %v723_v63  ;;  %1205 = vmatprep.mubr.bf16.mxu1 %v723_v63 }
  0x6b   : > { %v1799_v7 = vshrl.u32 %v270_v6, 7 }
  0x6c   : > { %1135 = vmatpush1.bf16.msra.mxu0 %v1566_v8  ;;  %1176 = vmatpush1.bf16.msra.mxu1 %v1569_v11 }
  0x6d   : > { %1136 = vmatprep.subr.bf16.mxu0 %v1574_v12  ;;  %1177 = vmatprep.subr.bf16.mxu1 %v1577_v13  ;;  %v272_v8 = vsub.s32 0, %v1799_v7  ;;  %v276_v10 = vsub.s32 1, %v1799_v7 }
  0x6f   : > { %v273_v11 = vrot.slane %v268_v9, %v272_v8  ;;  %v277_v12 = vrot.slane %v268_v9, %v276_v10 }
  0x70   : > { %1137 = vmatpush1.bf16.msra.mxu0 %v1572_v14  ;;  %1178 = vmatpush1.bf16.msra.mxu1 %v1575_v15 }
  0x71   : > { %1138 = vmatprep.subr.bf16.mxu0 %v1580_v16  ;;  %1179 = vmatprep.subr.bf16.mxu1 %v1583_v17 }
  0x74   : > { %1139 = vmatpush1.bf16.msra.mxu0 %v1578_v18  ;;  %1180 = vmatpush1.bf16.msra.mxu1 %v1581_v19  ;;  %v284_v19 = vsub.s32 3, %v1799_v7 }
  0x75   : > { %1140 = vmatprep.subr.bf16.mxu0 %v1586_v20  ;;  %1181 = vmatprep.subr.bf16.mxu1 %v1589_v21 }
  0x78   : > { %1141 = vmatpush1.bf16.msra.mxu0 %v1584_v22  ;;  %1182 = vmatpush1.bf16.msra.mxu1 %v1587_v23  ;;  %v280_v23 = vsub.s32 2, %v1799_v7 }
  0x79   : > { %1142 = vmatprep.subr.bf16.mxu0 %v1592_v24  ;;  %1183 = vmatprep.subr.bf16.mxu1 %v1595_v25  ;;  %v285_v25 = vrot.slane %v268_v9, %v284_v19 }
  0x7c   : > { %1143 = vmatpush1.bf16.msra.mxu0 %v1590_v26  ;;  %1184 = vmatpush1.bf16.msra.mxu1 %v1593_v27  ;;  %v281_v27 = vrot.slane %v268_v9, %v280_v23 }
  0x7d   : > { %1144 = vmatprep.subr.bf16.mxu0 %v1598_v28  ;;  %1185 = vmatprep.subr.bf16.mxu1 %v1601_v29 }
  0x80   : > { %1145 = vmatpush1.bf16.msra.mxu0 %v1596_v30  ;;  %1186 = vmatpush1.bf16.msra.mxu1 %v1599_v31 }
  0x81   : > { %1146 = vmatprep.subr.bf16.mxu0 %v1604_v32  ;;  %1187 = vmatprep.subr.bf16.mxu1 %v1607_v33 }
  0x84   : > { %1147 = vmatpush1.bf16.msra.mxu0 %v1602_v34  ;;  %1188 = vmatpush1.bf16.msra.mxu1 %v1605_v35 }
  0x85   : > { %1148 = vmatprep.subr.bf16.mxu0 %v1610_v36  ;;  %1189 = vmatprep.subr.bf16.mxu1 %v1613_v37 }
  0x88   : > { %1149 = vmatpush2.bf16.msra.mxu0 %v1608_v38  ;;  %1190 = vmatpush2.bf16.msra.mxu1 %v1611_v39  ;;  %v201_v39 = vld [vmem:[#allocation3] sm:$0x3] }
  0x89   : > { %1150 = vmatprep.subr.bf16.mxu0 %v1616_v40  ;;  %1191 = vmatprep.subr.bf16.mxu1 %v1619_v41 }
  0x8c   : > { %1151 = vmatpush2.bf16.msra.mxu0 %v1614_v42  ;;  %1192 = vmatpush2.bf16.msra.mxu1 %v1617_v43 }
  0x8d   : > { %1152 = vmatprep.subr.bf16.mxu0 %v1622_v44  ;;  %1193 = vmatprep.subr.bf16.mxu1 %v1625_v45 }
  0x90   : > { %1153 = vmatpush2.bf16.msra.mxu0 %v1620_v46  ;;  %1194 = vmatpush2.bf16.msra.mxu1 %v1623_v47 }
  0x91   : > { %1154 = vmatprep.subr.bf16.mxu0 %v1628_v48  ;;  %1195 = vmatprep.subr.bf16.mxu1 %v1631_v49  ;;  %v1370_v49 = vld [vmem:[%s1823_s2 + $0x4] sm:$0xf] }
  0x94   : > { %1155 = vmatpush2.bf16.msra.mxu0 %v1626_v50  ;;  %1196 = vmatpush2.bf16.msra.mxu1 %v1629_v51  ;;  %v795_v50 = vrot.slane %v1370_v49, %v272_v8  ;;  %v799_v51 = vrot.slane %v1370_v49, %v276_v10 }
  0x95   : > { %1156 = vmatprep.subr.bf16.mxu0 %v1634_v53  ;;  %1197 = vmatprep.subr.bf16.mxu1 %v1637_v55 }
  0x98   : > { %1157 = vmatpush2.bf16.msra.mxu0 %v1632_v52  ;;  %1198 = vmatpush2.bf16.msra.mxu1 %v1635_v54 }
  0x99   : > { %1158 = vmatprep.subr.bf16.mxu0 %v1640_v56  ;;  %1199 = vmatprep.subr.bf16.mxu1 %v1643_v57 }
  0x9c   : > { %1159 = vmatpush2.bf16.msra.mxu0 %v1638_v58  ;;  %1200 = vmatpush2.bf16.msra.mxu1 %v1641_v59 }
  0x9d   : > { %1160 = vmatprep.subr.bf16.mxu0 %v1646_v60  ;;  %1201 = vmatprep.subr.bf16.mxu1 %v1649_v61 }
  0xa0   : > { %1161 = vmatpush2.bf16.msra.mxu0 %v1644_v0  ;;  %1202 = vmatpush2.bf16.msra.mxu1 %v1647_v1  ;;  %v807_v0 = vrot.slane %v1370_v49, %v284_v19 }
  0xa1   : > { %1162 = vmatprep.subr.bf16.mxu0 %v1652_v2  ;;  %1203 = vmatprep.subr.bf16.mxu1 %v1655_v3  ;;  %v803_v2 = vrot.slane %v1370_v49, %v280_v23 }
  0xa4   : > { %1163 = vmatpush2.bf16.msra.mxu0 %v1650_v4  ;;  %1204 = vmatpush2.bf16.msra.mxu1 %v1653_v5 }
 0x127   : > { %v644_v13 = vpop.f32.mrf.mxu0  ;;  %v685_v21 = vpop.f32.mrf.mxu1 }
 0x128   : > { %v645_v14 = vadd.f32 %v644_v13, %v273_v11  ;;  %v686_v30 = vadd.f32 %v685_v21, %v281_v27  ;;  %v721_v11 = vld [vmem:[#allocation3 + $0x2] sm:$0x3] }
 0x129   : > { %v646_v15 = vpop.f32.mrf.mxu0  ;;  %v687_v24 = vpop.f32.mrf.mxu1 }
 0x12a   : > { %v1367_v16 = vmul.f32 -1.442695, %v645_v14  ;;  %v647_v17 = vadd.f32 %v646_v15, %v277_v12  ;;  %v688_v29 = vadd.f32 %v687_v24, %v285_v25 }
 0x12b   : > { %v648_v18 = vpop.f32.mrf.mxu0  ;;  %v689_v26 = vpop.f32.mrf.mxu1 }
 0x12c   : > { %1656 = vpow2.f32 %v1367_v16  ;;  %v1368_v20 = vmul.f32 -1.442695, %v647_v17  ;;  %v1369_v31 = vmul.f32 -1.442695, %v688_v29 }
 0x12d   : > { %v649_v22 = vpop.f32.mrf.mxu0  ;;  %v690_v28 = vpop.f32.mrf.mxu1 }
 0x12e   : > { %1658 = vpow2.f32 %v1368_v20 }
 0x12f   : > { %1660 = vtanh.f32 %v686_v30 }
 0x130   : > { %1662 = vpow2.f32 %v1369_v31 }
 0x139   : > { %v1657_v32 = vpop.eup %1656 }
 0x13a   : > { %v695_v33 = vadd.f32 1.0, %v1657_v32 }
 0x13b   : > { %v1659_v34 = vpop.eup %1658 }
 0x13c   : > { %1664 = vrcp.f32 %v695_v33  ;;  %v701_v35 = vadd.f32 1.0, %v1659_v34  ;;  %v1661_v36 = vpop.eup %1660 }
 0x13d   : > { %v1663_v37 = vpop.eup %1662 }
 0x13e   : > { %1666 = vrcp.f32 %v701_v35  ;;  %v708_v41 = vadd.f32 1.0, %v1663_v37 }
 0x140   : > { %1668 = vrcp.f32 %v708_v41 }
 0x149   : > { %v1665_v38 = vpop.eup %1664 }
 0x14a   : > { %v712_v43 = vmul.f32 %v1665_v38, %v1661_v36 }
 0x14b   : > { %v1667_v40 = vpop.eup %1666 }
 0x14c   : > { %v711_v42 = vmul.f32 %v1667_v40, %v201_v39 }
 0x14d   : > { %v1669_v45 = vpop.eup %1668 }
 0x14e   : > { %v713_v44 = vadd.f32 %v712_v43, %v711_v42 }
 0x150   : > { %1670 = vtanh.f32 %v713_v44  ;;  %717 = vst [vmem:[#allocation3] sm:$0x3] %v713_v44 }
 0x15d   : > { %v1671_v46 = vpop.eup %1670 }
 0x15e   : > { %v715_v47 = vmul.f32 %v1671_v46, %v1669_v45 }
 0x160   : > { %716 = vst [vmem:[#allocation2] sm:$0x3] %v715_v47  ;;  %v722_v48 = vpack.c.bf16 %v715_v47, %v715_v47 }
 0x162   : > { %1165 = vmatmul.mubr.bf16.vlgmr.msra.gmra.mxu0 %v722_v48  ;;  %1206 = vmatmul.mubr.bf16.vlgmr.msra.gmra.mxu1 %v722_v48 }
 0x222   : > { %v1166_v52 = vpop.f32.mrf.mxu0  ;;  %v1207_v53 = vpop.f32.mrf.mxu1 }
 0x223   : > { %v1167_v54 = vadd.f32 %v1166_v52, %v795_v50  ;;  %v1208_v5 = vadd.f32 %v1207_v53, %v803_v2 }
 0x224   : > { %v1168_v55 = vpop.f32.mrf.mxu0  ;;  %v1209_v56 = vpop.f32.mrf.mxu1 }
 0x225   : > { %v1435_v57 = vmul.f32 -1.442695, %v1167_v54  ;;  %v1169_v58 = vadd.f32 %v1168_v55, %v799_v51  ;;  %v1210_v1 = vadd.f32 %v1209_v56, %v807_v0 }
 0x226   : > { %v1170_v59 = vpop.f32.mrf.mxu0  ;;  %v1211_v60 = vpop.f32.mrf.mxu1 }
 0x227   : > { %1672 = vpow2.f32 %v1435_v57  ;;  %v1436_v61 = vmul.f32 -1.442695, %v1169_v58  ;;  %v1437_v3 = vmul.f32 -1.442695, %v1210_v1 }
 0x228   : > { %v1171_v62 = vpop.f32.mrf.mxu0  ;;  %v1212_v63 = vpop.f32.mrf.mxu1 }
 0x229   : > { %1674 = vpow2.f32 %v1436_v61 }
 0x22a   : > { %1676 = vpow2.f32 %v1437_v3 }
 0x234   : > { %v1673_v4 = vpop.eup %1672 }
 0x235   : > { %v1217_v6 = vadd.f32 1.0, %v1673_v4 }
 0x236   : > { %v1675_v7 = vpop.eup %1674 }
 0x237   : > { %1678 = vrcp.f32 %v1217_v6  ;;  %v1223_v8 = vadd.f32 1.0, %v1675_v7  ;;  %v1677_v9 = vpop.eup %1676 }
 0x238   : > { %1680 = vtanh.f32 %v1208_v5  ;;  %v1230_v14 = vadd.f32 1.0, %v1677_v9 }
 0x239   : > { %1682 = vrcp.f32 %v1223_v8 }
 0x23a   : > { %1684 = vrcp.f32 %v1230_v14 }
 0x244   : > { %v1679_v10 = vpop.eup %1678 }
 0x245   : > { %v1681_v12 = vpop.eup %1680 }
 0x246   : > { %v1683_v13 = vpop.eup %1682  ;;  %v1234_v15 = vmul.f32 %v1681_v12, %v1679_v10 }
 0x247   : > { %v1233_v16 = vmul.f32 %v1683_v13, %v721_v11  ;;  %v1685_v18 = vpop.eup %1684 }
 0x249   : > { %v1235_v17 = vadd.f32 %v1234_v15, %v1233_v16 }
 0x24b   : > { %1686 = vtanh.f32 %v1235_v17  ;;  %1239 = vst [vmem:[#allocation3 + $0x2] sm:$0x3] %v1235_v17 }
 0x257   : > { %1243 = sbr.rel (%p1438_p2) target bundleno = 612 (0x264), region = 44 }
 0x258   : > { %v1687_v19 = vpop.eup %1686 }
 0x259   : > { %v1237_v20 = vmul.f32 %v1687_v19, %v1685_v18 }
 0x25b   : > { %1238 = vst [vmem:[#allocation2 + $0x2] sm:$0x3] %v1237_v20 }
 0x25c   : > { %v1248_v22 = vld [vmem:[#allocation3] sm:$0xf]  }
 0x25d   : > { %1250 = vst [vmem:[%s1825_s4] sm:$0xf] %v1248_v22  }
 0x262   : > { %v1244_v21 = vld [vmem:[#allocation2] sm:$0xf]  }
 0x263   : > { %1246 = vst [vmem:[%s1824_s3] sm:$0xf] %v1244_v21  }
 0x264 PF: > { %s16_s15 = sadd.s32 1, %s1724_s15  }
 0x265   : > { %p13_p3 = scmp.ge.s32.totalorder %s16_s15, 10  }
 0x267   :  { %15 = sbr.rel (!%p13_p3) target bundleno = 1 (0x1), region = 83 }
 0x26c   :  { %1269 = vsyncpa [#allocation5], 1 }
 0x26d   :  { %1271 = vsyncpa [#allocation5 + $0x1], 1 }

// kernel: seq2seq_forward.3
= control target key start
LH: loop header
LB: loop body
LE: loop exit
PB: predicated region body
PF: predicated region fallthrough
CT: control target
= control target key end

     0   :  { %s2809_s0 = inlined_call_operand.vmem [shape: s32[8], index: 0, kind: input, shape index: {}]   ;;  %s2810_s1 = inlined_call_operand.vmem [shape: f32[8,2,128], index: 1, kind: input, shape index: {}]   ;;  %s2811_s2 = inlined_call_operand.vmem [shape: f32[2,2,128], index: 2, kind: input, shape index: {}]   ;;  %s2812_s3 = inlined_call_operand.vmem [shape: f32[2,2,128], index: 3, kind: input, shape index: {}]   ;;  %s2813_s4 = inlined_call_operand.vmem [shape: bf16[128,128], index: 4, kind: input, shape index: {}]   ;;  %s2814_s5 = inlined_call_operand.vmem [shape: bf16[2,256,512], index: 5, kind: input, shape index: {}]   ;;  %s2815_s6 = inlined_call_operand.vmem [shape: f32[2,1,512], index: 6, kind: input, shape index: {}]   ;;  %s2816_s7 = inlined_call_operand.vmem [shape: bf16[128,128], index: 7, kind: input, shape index: {}]   ;;  %s2817_s8 = inlined_call_operand.vmem [shape: f32[1,128], index: 8, kind: input, shape index: {}]   ;;  %s2818_s9 = inlined_call_operand.vmem [shape: f32[8,2,128], index: 9, kind: output, shape index: {}]  }
   0x1   :  { %s14_s11 = sshll.u32 %s2809_s0, 4  ;;  %s15_s11 = int_to_ptr.vmem [resolvable:$true] %s14_s11 }
   0x2   :  { %s2209_s12 = scalar_lea.vmem %s15_s11, 16  ;;  %p2214_p1 = scmp.lt.s32.totalorder %s15_s11, %s15_s11 }
   0x3   :  { %p2210_p0 = scmp.ne.s32.totalorder %s15_s11, %s2209_s12  ;;  %p2215_p2 = scmp.lt.s32.totalorder %s2209_s12, %s2209_s12 }
   0x5   :  { %p2216_p3 = por %p2215_p2, %p2214_p1 }
   0x7   :  { %p2217_p4 = pnand %p2216_p3, %p2210_p0 }
   0x9   :  { %2220 = shalt.err (!%p2217_p4)  }
   0xa   :  { %s2231_s13 = smov [#allocation6]  }
   0xb   :  { %17 = dma.vmem_to_smem %s15_s11, 16, %s2231_s13, [#allocation5] }
   0xc   :  { %2225 = dma.done.wait [#allocation5], 16 }
   0xd   :  { %2226 = vsyncadd [#allocation5], 4294967280 }
   0xe   :  { %19 = sfence }
   0xf   :  { %s2287_s14 = smov 0  }
  0x10 LB: > { %s2293_s0 = sadd.s32 4294967295, %s2229_s14   ;;  %p1677_p5 = scmp.ge.s32.totalorder %s2229_s14, 1  ;;  %s2229_s14 = sphi %s2287_s14, %s25_s14  }
  0x11   : > { %p268_p6 = scmp.lt.s32.totalorder %s2229_s14, 9 }
  0x13   : > { %p269_p7 = pnand %p1677_p5, %p268_p6 }
  0x14   : > { %p300_p8 = scmp.lt.s32.totalorder (!%p269_p7), %s2293_s0, 7  ;;  %p1680_p9 = scmp.ne.s32.totalorder (!%p269_p7), %s2293_s0, 0 }
  0x15   : > { %272 = sbr.rel (%p269_p7) target bundleno = 1396 (0x574), region = 52 }
  0x1a   : > { %s301_s15 = scalar_select %p300_p8, %s2293_s0, 7 }
  0x1b   : > { %312 = sbr.rel (%p1680_p9) target bundleno = 36 (0x24), region = 56 }
  0x1c   : > { %s1678_s16 = sshll.u32 %s301_s15, 1 }
  0x1d   : > { %s2302_s19 = scalar_lea.vmem %s2810_s1, %s1678_s16  ;;  %s2307_s22 = scalar_lea.vmem %s2818_s9, %s1678_s16 }
  0x20   : > { %v313_v0 = vld [vmem:[%s2811_s2] sm:$0xf]  }
  0x21   : > { %v317_v1 = vld [vmem:[%s2812_s3] sm:$0xf]   ;;  %315 = vst [vmem:[#allocation2] sm:$0xf] %v313_v0  }
  0x22   : > { %v321_v2 = vld [vmem:[%s2302_s19] sm:$0x3]  ;;  %319 = vst [vmem:[#allocation3] sm:$0xf] %v317_v1  }
  0x23   : > { %322 = vst [vmem:[#allocation4] sm:$0x3] %v321_v2 }
  0x24 PF: > { %v1969_v3 = vld [vmem:[%s2813_s4 + $0x38] sm:$0xff]   ;;  %v2232_v4 = vmov 0.0   ;;  %v1970_v5 = vld [vmem:[%s2813_s4 + $0x30] sm:$0xff]   ;;  %vm2233_vm0 = vmmov 0   ;;  %v1971_v6 = vld [vmem:[%s2813_s4 + $0x28] sm:$0xff]   ;;  %vm1584_vm1 = vcmask 1041408  }
  0x25   : > { %1918 = vmatprep.subr.bf16.mxu0 %v2232_v4  ;;  %1934 = vmatprep.mubr.msk.bf16.mxu0 %vm2233_vm0, %v2232_v4  ;;  %v1977_v7 = vld [vmem:[%s2814_s5 + $0xe4] ss:$16 sps:$4 sm:$0xff]   ;;  %v1982_v9 = vld [vmem:[%s2814_s5 + $0xe0] ss:$16 sps:$4 sm:$0xff]   ;;  %v1973_v11 = vld [vmem:[%s2813_s4 + $0x18] sm:$0xff]  }
  0x26   : > { %1919 = vmatpush3.bf16.msra.mxu0 %v1969_v3  ;;  %v1972_v8 = vld [vmem:[%s2813_s4 + $0x20] sm:$0xff]   ;;  %839 = vmatprep.subr.bf16.mxu1 %v1977_v7  ;;  %v1974_v16 = vld [vmem:[%s2813_s4 + $0x10] sm:$0xff]   ;;  %v1975_v19 = vld [vmem:[%s2813_s4 + $0x8] sm:$0xff]  }
  0x27   : > { %1920 = vmatprep.subr.bf16.mxu0 %v2232_v4  ;;  %v1983_v10 = vld [vmem:[%s2814_s5 + $0xc4] ss:$16 sps:$4 sm:$0xff]   ;;  %840 = vmatpush1.bf16.msra.mxu1 %v1982_v9  ;;  %v1988_v12 = vld [vmem:[%s2814_s5 + $0xc0] ss:$16 sps:$4 sm:$0xff]   ;;  %v1981_v24 = vld [vmem:[%s2814_s5 + $0xec] ss:$16 sps:$4 sm:$0xff]  }
  0x28   : > { %841 = vmatprep.subr.bf16.mxu1 %v1983_v10  ;;  %v1989_v13 = vld [vmem:[%s2814_s5 + $0xa4] ss:$16 sps:$4 sm:$0xff]   ;;  %v1994_v14 = vld [vmem:[%s2814_s5 + $0xa0] ss:$16 sps:$4 sm:$0xff]   ;;  %v1979_v28 = vld [vmem:[%s2814_s5 + $0xe8] ss:$16 sps:$4 sm:$0xff]  }
  0x29   : > { %v1995_v15 = vld [vmem:[%s2814_s5 + $0x84] ss:$16 sps:$4 sm:$0xff]   ;;  %v2000_v17 = vld [vmem:[%s2814_s5 + $0x80] ss:$16 sps:$4 sm:$0xff]   ;;  %v1987_v29 = vld [vmem:[%s2814_s5 + $0xcc] ss:$16 sps:$4 sm:$0xff]  }
  0x2a   : > { %1921 = vmatpush3.bf16.msra.mxu0 %v1970_v5  ;;  %v2001_v18 = vld [vmem:[%s2814_s5 + $0x64] ss:$16 sps:$4 sm:$0xff]   ;;  %v2006_v20 = vld [vmem:[%s2814_s5 + $0x60] ss:$16 sps:$4 sm:$0xff]   ;;  %v323_v23 = vld [vmem:[#allocation4] sm:$0x3] }
  0x2b   : > { %1922 = vmatprep.subr.bf16.mxu0 %v2232_v4  ;;  %842 = vmatpush1.bf16.msra.mxu1 %v1988_v12  ;;  %v2007_v21 = vld [vmem:[%s2814_s5 + $0x44] ss:$16 sps:$4 sm:$0xff]   ;;  %v2012_v25 = vld [vmem:[%s2814_s5 + $0x40] ss:$16 sps:$4 sm:$0xff]   ;;  %v324_v26 = vpack.c.bf16 %v323_v23, %v323_v23  ;;  %v1985_v32 = vld [vmem:[%s2814_s5 + $0xc8] ss:$16 sps:$4 sm:$0xff]  }
  0x2c   : > { %843 = vmatprep.subr.bf16.mxu1 %v1989_v13  ;;  %v1976_v22 = vld [vmem:[%s2813_s4] sm:$0xff]   ;;  %v1993_v33 = vld [vmem:[%s2814_s5 + $0xac] ss:$16 sps:$4 sm:$0xff]   ;;  %v1991_v36 = vld [vmem:[%s2814_s5 + $0xa8] ss:$16 sps:$4 sm:$0xff]  }
  0x2d   : > { %v2013_v27 = vld [vmem:[%s2814_s5 + $0x24] ss:$16 sps:$4 sm:$0xff]   ;;  %v2018_v30 = vld [vmem:[%s2814_s5 + $0x20] ss:$16 sps:$4 sm:$0xff]   ;;  %v1999_v37 = vld [vmem:[%s2814_s5 + $0x8c] ss:$16 sps:$4 sm:$0xff]  }
  0x2e   : > { %1923 = vmatpush3.bf16.msra.mxu0 %v1971_v6  ;;  %v2019_v31 = vld [vmem:[%s2814_s5 + $0x4] ss:$16 sps:$4 sm:$0xff]   ;;  %v2024_v34 = vld [vmem:[%s2814_s5] ss:$16 sps:$4 sm:$0xff]   ;;  %v1997_v40 = vld [vmem:[%s2814_s5 + $0x88] ss:$16 sps:$4 sm:$0xff]  }
  0x2f   : > { %1924 = vmatprep.subr.bf16.mxu0 %v2232_v4  ;;  %844 = vmatpush1.bf16.msra.mxu1 %v1994_v14  ;;  %v2025_v35 = vld [vmem:[%s2814_s5 + $0x1e4] ss:$16 sps:$4 sm:$0xff]   ;;  %v2030_v38 = vld [vmem:[%s2814_s5 + $0x1e0] ss:$16 sps:$4 sm:$0xff]   ;;  %v2005_v41 = vld [vmem:[%s2814_s5 + $0x6c] ss:$16 sps:$4 sm:$0xff]  }
  0x30   : > { %845 = vmatprep.subr.bf16.mxu1 %v1995_v15  ;;  %v2031_v39 = vld [vmem:[%s2814_s5 + $0x1c4] ss:$16 sps:$4 sm:$0xff]   ;;  %v2036_v42 = vld [vmem:[%s2814_s5 + $0x1c0] ss:$16 sps:$4 sm:$0xff]   ;;  %v2003_v44 = vld [vmem:[%s2814_s5 + $0x68] ss:$16 sps:$4 sm:$0xff]  }
  0x31   : > { %v2037_v43 = vld [vmem:[%s2814_s5 + $0x1a4] ss:$16 sps:$4 sm:$0xff]   ;;  %v2011_v45 = vld [vmem:[%s2814_s5 + $0x4c] ss:$16 sps:$4 sm:$0xff]   ;;  %v2009_v46 = vld [vmem:[%s2814_s5 + $0x48] ss:$16 sps:$4 sm:$0xff]  }
  0x32   : > { %1925 = vmatpush3.bf16.msra.mxu0 %v1972_v8  ;;  %v2042_v47 = vld [vmem:[%s2814_s5 + $0x1a0] ss:$16 sps:$4 sm:$0xff]   ;;  %v2043_v48 = vld [vmem:[%s2814_s5 + $0x184] ss:$16 sps:$4 sm:$0xff]   ;;  %v2017_v49 = vld [vmem:[%s2814_s5 + $0x2c] ss:$16 sps:$4 sm:$0xff]  }
  0x33   : > { %1926 = vmatprep.subr.bf16.mxu0 %v2232_v4  ;;  %846 = vmatpush1.bf16.msra.mxu1 %v2000_v17  ;;  %v2048_v50 = vld [vmem:[%s2814_s5 + $0x180] ss:$16 sps:$4 sm:$0xff]   ;;  %v2049_v51 = vld [vmem:[%s2814_s5 + $0x164] ss:$16 sps:$4 sm:$0xff]   ;;  %v2015_v52 = vld [vmem:[%s2814_s5 + $0x28] ss:$16 sps:$4 sm:$0xff]  }
  0x34   : > { %847 = vmatprep.subr.bf16.mxu1 %v2001_v18  ;;  %v2023_v53 = vld [vmem:[%s2814_s5 + $0xc] ss:$16 sps:$4 sm:$0xff]   ;;  %v2054_v54 = vld [vmem:[%s2814_s5 + $0x160] ss:$16 sps:$4 sm:$0xff]   ;;  %v2055_v55 = vld [vmem:[%s2814_s5 + $0x144] ss:$16 sps:$4 sm:$0xff]  }
  0x35   : > { %v2021_v56 = vld [vmem:[%s2814_s5 + $0x8] ss:$16 sps:$4 sm:$0xff]   ;;  %v2029_v57 = vld [vmem:[%s2814_s5 + $0x1ec] ss:$16 sps:$4 sm:$0xff]   ;;  %v2060_v58 = vld [vmem:[%s2814_s5 + $0x140] ss:$16 sps:$4 sm:$0xff]  }
  0x36   : > { %1927 = vmatpush3.bf16.msra.mxu0 %v1973_v11  ;;  %v2061_v59 = vld [vmem:[%s2814_s5 + $0x124] ss:$16 sps:$4 sm:$0xff]   ;;  %v2027_v60 = vld [vmem:[%s2814_s5 + $0x1e8] ss:$16 sps:$4 sm:$0xff]   ;;  %v2035_v61 = vld [vmem:[%s2814_s5 + $0x1cc] ss:$16 sps:$4 sm:$0xff]  }
  0x37   : > { %1928 = vmatprep.subr.bf16.mxu0 %v2232_v4  ;;  %848 = vmatpush1.bf16.msra.mxu1 %v2006_v20  ;;  %v2066_v62 = vld [vmem:[%s2814_s5 + $0x120] ss:$16 sps:$4 sm:$0xff]   ;;  %v2067_v63 = vld [vmem:[%s2814_s5 + $0x104] ss:$16 sps:$4 sm:$0xff]   ;;  %v2033_v0 = vld [vmem:[%s2814_s5 + $0x1c8] ss:$16 sps:$4 sm:$0xff]  }
  0x38   : > { %849 = vmatprep.subr.bf16.mxu1 %v2007_v21  ;;  %v2041_v1 = vld [vmem:[%s2814_s5 + $0x1ac] ss:$16 sps:$4 sm:$0xff]   ;;  %v2039_v2 = vld [vmem:[%s2814_s5 + $0x1a8] ss:$16 sps:$4 sm:$0xff]   ;;  %v2072_v14 = vld [vmem:[%s2814_s5 + $0x100] ss:$16 sps:$4 sm:$0xff]  }
  0x39   : > { %v2047_v3 = vld [vmem:[%s2814_s5 + $0x18c] ss:$16 sps:$4 sm:$0xff]   ;;  %v2045_v5 = vld [vmem:[%s2814_s5 + $0x188] ss:$16 sps:$4 sm:$0xff]   ;;  %v429_v15 = vld [vmem:[#allocation2] sm:$0x3] }
  0x3a   : > { %1929 = vmatpush3.bf16.msra.mxu0 %v1974_v16  ;;  %v2053_v6 = vld [vmem:[%s2814_s5 + $0x16c] ss:$16 sps:$4 sm:$0xff]   ;;  %v2051_v7 = vld [vmem:[%s2814_s5 + $0x168] ss:$16 sps:$4 sm:$0xff]   ;;  %v432_v16 = vpack.c.bf16 %v429_v15, %v429_v15  ;;  %v2075_v17 = vld [vmem:[%s2814_s5 + $0x2e4] ss:$16 sps:$4 sm:$0xff]  }
  0x3b   : > { %1930 = vmatprep.subr.bf16.mxu0 %v2232_v4  ;;  %850 = vmatpush1.bf16.msra.mxu1 %v2012_v25  ;;  %v2059_v8 = vld [vmem:[%s2814_s5 + $0x14c] ss:$16 sps:$4 sm:$0xff]   ;;  %v2057_v9 = vld [vmem:[%s2814_s5 + $0x148] ss:$16 sps:$4 sm:$0xff]   ;;  %v2073_v20 = vld [vmem:[%s2814_s5 + $0x2e0] ss:$16 sps:$4 sm:$0xff]  }
  0x3c   : > { %851 = vmatprep.subr.bf16.mxu1 %v2013_v27  ;;  %v2065_v10 = vld [vmem:[%s2814_s5 + $0x12c] ss:$16 sps:$4 sm:$0xff]   ;;  %v2063_v11 = vld [vmem:[%s2814_s5 + $0x128] ss:$16 sps:$4 sm:$0xff]   ;;  %871 = vmatprep.mubr.bf16.mxu1 %v432_v16  ;;  %v2081_v23 = vld [vmem:[%s2814_s5 + $0x2c4] ss:$16 sps:$4 sm:$0xff]  }
  0x3d   : > { %v2071_v12 = vld [vmem:[%s2814_s5 + $0x10c] ss:$16 sps:$4 sm:$0xff]   ;;  %v2069_v13 = vld [vmem:[%s2814_s5 + $0x108] ss:$16 sps:$4 sm:$0xff]   ;;  %v2079_v27 = vld [vmem:[%s2814_s5 + $0x2c0] ss:$16 sps:$4 sm:$0xff]  }
  0x3e   : > { %1931 = vmatpush3.bf16.msra.mxu0 %v1975_v19  ;;  %v2078_v18 = vld [vmem:[%s2814_s5 + $0x2ec] ss:$16 sps:$4 sm:$0xff]   ;;  %v2076_v21 = vld [vmem:[%s2814_s5 + $0x2e8] ss:$16 sps:$4 sm:$0xff]   ;;  %v2159_v15 = vld [vmem:[%s2814_s5 + $0x324] ss:$16 sps:$4 sm:$0xff]  }
  0x3f   : > { %1932 = vmatprep.subr.bf16.mxu0 %v2232_v4  ;;  %852 = vmatpush1.bf16.msra.mxu1 %v2018_v30  ;;  %v2087_v30 = vld [vmem:[%s2814_s5 + $0x2a4] ss:$16 sps:$4 sm:$0xff]  }
  0x40   : > { %853 = vmatprep.subr.bf16.mxu1 %v2019_v31  ;;  %v2090_v31 = vld [vmem:[%s2814_s5 + $0x2ac] ss:$16 sps:$4 sm:$0xff]  }
  0x42   : > { %1933 = vmatpush3.bf16.msra.mxu0 %v1976_v22 }
  0x43   : > { %880 = vmatprep.subr.bf16.mxu0 %v1981_v24  ;;  %854 = vmatpush1.bf16.msra.mxu1 %v2024_v34  ;;  %v2084_v24 = vld [vmem:[%s2814_s5 + $0x2cc] ss:$16 sps:$4 sm:$0xff]   ;;  %v2093_v34 = vld [vmem:[%s2814_s5 + $0x284] ss:$16 sps:$4 sm:$0xff]  }
  0x44   : > { %855 = vmatprep.subr.bf16.mxu1 %v2025_v35  ;;  %v2096_v35 = vld [vmem:[%s2814_s5 + $0x28c] ss:$16 sps:$4 sm:$0xff]  }
  0x45   : > { %1935 = vmatmul.mubr.bf16.vlgmr.msra.gmra.mxu0 %v324_v26 }
  0x46   : > { %881 = vmatpush1.bf16.msra.mxu0 %v1979_v28  ;;  %912 = vmatprep.mubr.bf16.mxu0 %v432_v16  ;;  %v2082_v28 = vld [vmem:[%s2814_s5 + $0x2c8] ss:$16 sps:$4 sm:$0xff]   ;;  %v2162_v16 = vld [vmem:[%s2814_s5 + $0x32c] ss:$16 sps:$4 sm:$0xff]  }
  0x47   : > { %882 = vmatprep.subr.bf16.mxu0 %v1987_v29  ;;  %856 = vmatpush2.bf16.msra.mxu1 %v2030_v38  ;;  %v2099_v38 = vld [vmem:[%s2814_s5 + $0x264] ss:$16 sps:$4 sm:$0xff]  }
  0x48   : > { %857 = vmatprep.subr.bf16.mxu1 %v2031_v39  ;;  %v2102_v39 = vld [vmem:[%s2814_s5 + $0x26c] ss:$16 sps:$4 sm:$0xff]  }
  0x4a   : > { %883 = vmatpush1.bf16.msra.mxu0 %v1985_v32  ;;  %v2085_v32 = vld [vmem:[%s2814_s5 + $0x2a0] ss:$16 sps:$4 sm:$0xff]  }
  0x4b   : > { %884 = vmatprep.subr.bf16.mxu0 %v1993_v33  ;;  %858 = vmatpush2.bf16.msra.mxu1 %v2036_v42  ;;  %v2088_v33 = vld [vmem:[%s2814_s5 + $0x2a8] ss:$16 sps:$4 sm:$0xff]   ;;  %v2105_v42 = vld [vmem:[%s2814_s5 + $0x244] ss:$16 sps:$4 sm:$0xff]  }
  0x4c   : > { %859 = vmatprep.subr.bf16.mxu1 %v2037_v43  ;;  %v2108_v43 = vld [vmem:[%s2814_s5 + $0x24c] ss:$16 sps:$4 sm:$0xff]  }
  0x4e   : > { %885 = vmatpush1.bf16.msra.mxu0 %v1991_v36  ;;  %v2091_v36 = vld [vmem:[%s2814_s5 + $0x280] ss:$16 sps:$4 sm:$0xff]  }
  0x4f   : > { %886 = vmatprep.subr.bf16.mxu0 %v1999_v37  ;;  %860 = vmatpush2.bf16.msra.mxu1 %v2042_v47  ;;  %v2094_v37 = vld [vmem:[%s2814_s5 + $0x288] ss:$16 sps:$4 sm:$0xff]   ;;  %v2114_v47 = vld [vmem:[%s2814_s5 + $0x22c] ss:$16 sps:$4 sm:$0xff]  }
  0x50   : > { %861 = vmatprep.subr.bf16.mxu1 %v2043_v48  ;;  %v2109_v48 = vld [vmem:[%s2814_s5 + $0x220] ss:$16 sps:$4 sm:$0xff]  }
  0x52   : > { %887 = vmatpush1.bf16.msra.mxu0 %v1997_v40  ;;  %v2097_v40 = vld [vmem:[%s2814_s5 + $0x260] ss:$16 sps:$4 sm:$0xff]  }
  0x53   : > { %888 = vmatprep.subr.bf16.mxu0 %v2005_v41  ;;  %862 = vmatpush2.bf16.msra.mxu1 %v2048_v50  ;;  %v2100_v41 = vld [vmem:[%s2814_s5 + $0x268] ss:$16 sps:$4 sm:$0xff]   ;;  %v2117_v50 = vld [vmem:[%s2814_s5 + $0x204] ss:$16 sps:$4 sm:$0xff]  }
  0x54   : > { %863 = vmatprep.subr.bf16.mxu1 %v2049_v51  ;;  %v2120_v51 = vld [vmem:[%s2814_s5 + $0x20c] ss:$16 sps:$4 sm:$0xff]  }
  0x56   : > { %889 = vmatpush1.bf16.msra.mxu0 %v2003_v44  ;;  %v2103_v44 = vld [vmem:[%s2814_s5 + $0x240] ss:$16 sps:$4 sm:$0xff]  }
  0x57   : > { %890 = vmatprep.subr.bf16.mxu0 %v2011_v45  ;;  %864 = vmatpush2.bf16.msra.mxu1 %v2054_v54  ;;  %v2106_v45 = vld [vmem:[%s2814_s5 + $0x248] ss:$16 sps:$4 sm:$0xff]   ;;  %v2123_v54 = vld [vmem:[%s2814_s5 + $0x3e4] ss:$16 sps:$4 sm:$0xff]  }
  0x58   : > { %865 = vmatprep.subr.bf16.mxu1 %v2055_v55  ;;  %v2126_v55 = vld [vmem:[%s2814_s5 + $0x3ec] ss:$16 sps:$4 sm:$0xff]  }
  0x5a   : > { %891 = vmatpush1.bf16.msra.mxu0 %v2009_v46  ;;  %v2111_v46 = vld [vmem:[%s2814_s5 + $0x224] ss:$16 sps:$4 sm:$0xff]  }
  0x5b   : > { %892 = vmatprep.subr.bf16.mxu0 %v2017_v49  ;;  %866 = vmatpush2.bf16.msra.mxu1 %v2060_v58  ;;  %v2112_v49 = vld [vmem:[%s2814_s5 + $0x228] ss:$16 sps:$4 sm:$0xff]   ;;  %v2129_v58 = vld [vmem:[%s2814_s5 + $0x3c4] ss:$16 sps:$4 sm:$0xff]  }
  0x5c   : > { %867 = vmatprep.subr.bf16.mxu1 %v2061_v59  ;;  %v2132_v59 = vld [vmem:[%s2814_s5 + $0x3cc] ss:$16 sps:$4 sm:$0xff]  }
  0x5e   : > { %893 = vmatpush1.bf16.msra.mxu0 %v2015_v52  ;;  %v2115_v52 = vld [vmem:[%s2814_s5 + $0x200] ss:$16 sps:$4 sm:$0xff]  }
  0x5f   : > { %894 = vmatprep.subr.bf16.mxu0 %v2023_v53  ;;  %868 = vmatpush2.bf16.msra.mxu1 %v2066_v62  ;;  %v2118_v53 = vld [vmem:[%s2814_s5 + $0x208] ss:$16 sps:$4 sm:$0xff]   ;;  %v2135_v62 = vld [vmem:[%s2814_s5 + $0x3a4] ss:$16 sps:$4 sm:$0xff]  }
  0x60   : > { %869 = vmatprep.subr.bf16.mxu1 %v2067_v63  ;;  %v2138_v63 = vld [vmem:[%s2814_s5 + $0x3ac] ss:$16 sps:$4 sm:$0xff]  }
  0x62   : > { %895 = vmatpush1.bf16.msra.mxu0 %v2021_v56  ;;  %v2121_v56 = vld [vmem:[%s2814_s5 + $0x3e0] ss:$16 sps:$4 sm:$0xff]  }
  0x63   : > { %896 = vmatprep.subr.bf16.mxu0 %v2029_v57  ;;  %870 = vmatpush2.bf16.msra.mxu1 %v2072_v14  ;;  %v2124_v57 = vld [vmem:[%s2814_s5 + $0x3e8] ss:$16 sps:$4 sm:$0xff]  }
  0x64   : > { %1361 = vmatprep.subr.bf16.mxu1 %v2075_v17  ;;  %v2154_v14 = vld [vmem:[%s2814_s5 + $0x348] ss:$16 sps:$4 sm:$0xff]   ;;  %v948_v17 = vld [vmem:[#allocation2 + $0x2] sm:$0x3] }
  0x66   : > { %897 = vmatpush2.bf16.msra.mxu0 %v2027_v60  ;;  %v2127_v60 = vld [vmem:[%s2814_s5 + $0x3c0] ss:$16 sps:$4 sm:$0xff]  }
  0x67   : > { %898 = vmatprep.subr.bf16.mxu0 %v2035_v61  ;;  %v2130_v61 = vld [vmem:[%s2814_s5 + $0x3c8] ss:$16 sps:$4 sm:$0xff]  }
  0x6a   : > { %899 = vmatpush2.bf16.msra.mxu0 %v2033_v0  ;;  %v2133_v0 = vld [vmem:[%s2814_s5 + $0x3a0] ss:$16 sps:$4 sm:$0xff]  }
  0x6b   : > { %900 = vmatprep.subr.bf16.mxu0 %v2041_v1  ;;  %v2136_v1 = vld [vmem:[%s2814_s5 + $0x3a8] ss:$16 sps:$4 sm:$0xff]  }
  0x6e   : > { %901 = vmatpush2.bf16.msra.mxu0 %v2039_v2  ;;  %v2141_v2 = vld [vmem:[%s2814_s5 + $0x384] ss:$16 sps:$4 sm:$0xff]  }
  0x6f   : > { %902 = vmatprep.subr.bf16.mxu0 %v2047_v3  ;;  %v2144_v3 = vld [vmem:[%s2814_s5 + $0x38c] ss:$16 sps:$4 sm:$0xff]  }
  0x72   : > { %903 = vmatpush2.bf16.msra.mxu0 %v2045_v5  ;;  %v2139_v5 = vld [vmem:[%s2814_s5 + $0x380] ss:$16 sps:$4 sm:$0xff]  }
  0x73   : > { %904 = vmatprep.subr.bf16.mxu0 %v2053_v6  ;;  %v2142_v6 = vld [vmem:[%s2814_s5 + $0x388] ss:$16 sps:$4 sm:$0xff]  }
  0x76   : > { %905 = vmatpush2.bf16.msra.mxu0 %v2051_v7  ;;  %v2145_v7 = vld [vmem:[%s2814_s5 + $0x360] ss:$16 sps:$4 sm:$0xff]  }
  0x77   : > { %906 = vmatprep.subr.bf16.mxu0 %v2059_v8  ;;  %v2147_v8 = vld [vmem:[%s2814_s5 + $0x364] ss:$16 sps:$4 sm:$0xff]  }
  0x7a   : > { %907 = vmatpush2.bf16.msra.mxu0 %v2057_v9  ;;  %v2148_v9 = vld [vmem:[%s2814_s5 + $0x368] ss:$16 sps:$4 sm:$0xff]  }
  0x7b   : > { %908 = vmatprep.subr.bf16.mxu0 %v2065_v10  ;;  %v2150_v10 = vld [vmem:[%s2814_s5 + $0x36c] ss:$16 sps:$4 sm:$0xff]  }
  0x7e   : > { %909 = vmatpush2.bf16.msra.mxu0 %v2063_v11  ;;  %v2153_v11 = vld [vmem:[%s2814_s5 + $0x344] ss:$16 sps:$4 sm:$0xff]  }
  0x7f   : > { %910 = vmatprep.subr.bf16.mxu0 %v2071_v12  ;;  %v2156_v12 = vld [vmem:[%s2814_s5 + $0x34c] ss:$16 sps:$4 sm:$0xff]  }
  0x82   : > { %911 = vmatpush2.bf16.msra.mxu0 %v2069_v13  ;;  %v2151_v13 = vld [vmem:[%s2814_s5 + $0x340] ss:$16 sps:$4 sm:$0xff]  }
  0x83   : > { %1402 = vmatprep.subr.bf16.mxu0 %v2078_v18  ;;  %v952_v18 = vpack.c.bf16 %v948_v17, %v948_v17 }
 0x105   : > { %v423_v19 = vpop.f32.mrf.mxu0 }
 0x106   : > { %v431_v22 = vpack.c.bf16 %v423_v19, %v423_v19  ;;  %v2157_v19 = vld [vmem:[%s2814_s5 + $0x320] ss:$16 sps:$4 sm:$0xff]  }
 0x107   : > { %v1936_v25 = vpop.f32.mrf.mxu0 }
 0x108   : > { %872 = vmatmul.mubr.bf16.vlgmr.msra.gmra.mxu1 %v431_v22  ;;  %913 = vmatmul.mubr.bf16.vlgmr.msra.gmra.mxu0 %v431_v22  ;;  %v2168_v22 = vld [vmem:[%s2814_s5 + $0x30c] ss:$16 sps:$4 sm:$0xff]   ;;  %v499_v25 = vlaneseq }
 0x109   : > { %v426_v26 = vpop.f32.mrf.mxu0  ;;  %1362 = vmatpush1.bf16.msra.mxu1 %v2073_v20  ;;  %1403 = vmatpush1.bf16.msra.mxu0 %v2076_v21  ;;  %v2160_v20 = vld [vmem:[%s2814_s5 + $0x328] ss:$16 sps:$4 sm:$0xff]   ;;  %v2165_v21 = vld [vmem:[%s2814_s5 + $0x304] ss:$16 sps:$4 sm:$0xff]  }
 0x10a   : > { %1363 = vmatprep.subr.bf16.mxu1 %v2081_v23  ;;  %1404 = vmatprep.subr.bf16.mxu0 %v2084_v24  ;;  %v2163_v23 = vld [vmem:[%s2814_s5 + $0x300] ss:$16 sps:$4 sm:$0xff]   ;;  %v2166_v24 = vld [vmem:[%s2814_s5 + $0x308] ss:$16 sps:$4 sm:$0xff]   ;;  %v2737_v26 = vshrl.u32 %v499_v25, 7 }
 0x10b   : > { %v1937_v29 = vpop.f32.mrf.mxu0  ;;  %1393 = vmatprep.mubr.bf16.mxu1 %v952_v18  ;;  %1434 = vmatprep.mubr.bf16.mxu0 %v952_v18 }
 0x10c   : > { %v505_v29 = vsub.s32 1, %v2737_v26 }
 0x10d   : > { %1364 = vmatpush1.bf16.msra.mxu1 %v2079_v27  ;;  %1405 = vmatpush1.bf16.msra.mxu0 %v2082_v28  ;;  %v501_v27 = vsub.s32 0, %v2737_v26  ;;  %v497_v28 = vld [vmem:[%s2815_s6] sm:$0xf] }
 0x10e   : > { %1365 = vmatprep.subr.bf16.mxu1 %v2087_v30  ;;  %1406 = vmatprep.subr.bf16.mxu0 %v2090_v31  ;;  %v506_v31 = vrot.slane %v497_v28, %v505_v29 }
 0x10f   : > { %v502_v30 = vrot.slane %v497_v28, %v501_v27 }
 0x111   : > { %1366 = vmatpush1.bf16.msra.mxu1 %v2085_v32  ;;  %1407 = vmatpush1.bf16.msra.mxu0 %v2088_v33 }
 0x112   : > { %1367 = vmatprep.subr.bf16.mxu1 %v2093_v34  ;;  %1408 = vmatprep.subr.bf16.mxu0 %v2096_v35 }
 0x115   : > { %1368 = vmatpush1.bf16.msra.mxu1 %v2091_v36  ;;  %1409 = vmatpush1.bf16.msra.mxu0 %v2094_v37 }
 0x116   : > { %1369 = vmatprep.subr.bf16.mxu1 %v2099_v38  ;;  %1410 = vmatprep.subr.bf16.mxu0 %v2102_v39  ;;  %v513_v39 = vsub.s32 3, %v2737_v26 }
 0x119   : > { %1370 = vmatpush1.bf16.msra.mxu1 %v2097_v40  ;;  %1411 = vmatpush1.bf16.msra.mxu0 %v2100_v41 }
 0x11a   : > { %1371 = vmatprep.subr.bf16.mxu1 %v2105_v42  ;;  %1412 = vmatprep.subr.bf16.mxu0 %v2108_v43 }
 0x11d   : > { %1372 = vmatpush1.bf16.msra.mxu1 %v2103_v44  ;;  %1413 = vmatpush1.bf16.msra.mxu0 %v2106_v45  ;;  %v514_v45 = vrot.slane %v497_v28, %v513_v39 }
 0x11e   : > { %1373 = vmatprep.subr.bf16.mxu1 %v2111_v46  ;;  %1414 = vmatprep.subr.bf16.mxu0 %v2114_v47  ;;  %v509_v46 = vsub.s32 2, %v2737_v26 }
 0x121   : > { %1374 = vmatpush1.bf16.msra.mxu1 %v2109_v48  ;;  %1415 = vmatpush1.bf16.msra.mxu0 %v2112_v49  ;;  %v510_v48 = vrot.slane %v497_v28, %v509_v46 }
 0x122   : > { %1375 = vmatprep.subr.bf16.mxu1 %v2117_v50  ;;  %1416 = vmatprep.subr.bf16.mxu0 %v2120_v51 }
 0x125   : > { %1376 = vmatpush1.bf16.msra.mxu1 %v2115_v52  ;;  %1417 = vmatpush1.bf16.msra.mxu0 %v2118_v53 }
 0x126   : > { %1377 = vmatprep.subr.bf16.mxu1 %v2123_v54  ;;  %1418 = vmatprep.subr.bf16.mxu0 %v2126_v55 }
 0x129   : > { %1378 = vmatpush2.bf16.msra.mxu1 %v2121_v56  ;;  %1419 = vmatpush2.bf16.msra.mxu0 %v2124_v57  ;;  %v430_v57 = vld [vmem:[#allocation3] sm:$0x3] }
 0x12a   : > { %1379 = vmatprep.subr.bf16.mxu1 %v2129_v58  ;;  %1420 = vmatprep.subr.bf16.mxu0 %v2132_v59 }
 0x12d   : > { %1380 = vmatpush2.bf16.msra.mxu1 %v2127_v60  ;;  %1421 = vmatpush2.bf16.msra.mxu0 %v2130_v61 }
 0x12e   : > { %1381 = vmatprep.subr.bf16.mxu1 %v2135_v62  ;;  %1422 = vmatprep.subr.bf16.mxu0 %v2138_v63 }
 0x131   : > { %1382 = vmatpush2.bf16.msra.mxu1 %v2133_v0  ;;  %1423 = vmatpush2.bf16.msra.mxu0 %v2136_v1 }
 0x132   : > { %1383 = vmatprep.subr.bf16.mxu1 %v2141_v2  ;;  %1424 = vmatprep.subr.bf16.mxu0 %v2144_v3 }
 0x135   : > { %1384 = vmatpush2.bf16.msra.mxu1 %v2139_v5  ;;  %1425 = vmatpush2.bf16.msra.mxu0 %v2142_v6  ;;  %v2169_v5 = vld [vmem:[%s2816_s7 + $0x38] sm:$0xff]   ;;  %v2170_v6 = vld [vmem:[%s2816_s7 + $0x30] sm:$0xff]  }
 0x136   : > { %1385 = vmatprep.subr.bf16.mxu1 %v2147_v8  ;;  %1426 = vmatprep.subr.bf16.mxu0 %v2150_v10  ;;  %v2172_v8 = vld [vmem:[%s2816_s7 + $0x20] sm:$0xff]   ;;  %v2174_v10 = vld [vmem:[%s2816_s7 + $0x10] sm:$0xff]  }
 0x139   : > { %1386 = vmatpush2.bf16.msra.mxu1 %v2145_v7  ;;  %1427 = vmatpush2.bf16.msra.mxu0 %v2148_v9  ;;  %v2171_v7 = vld [vmem:[%s2816_s7 + $0x28] sm:$0xff]   ;;  %v2173_v9 = vld [vmem:[%s2816_s7 + $0x18] sm:$0xff]  }
 0x13a   : > { %1387 = vmatprep.subr.bf16.mxu1 %v2153_v11  ;;  %1428 = vmatprep.subr.bf16.mxu0 %v2156_v12  ;;  %v2175_v11 = vld [vmem:[%s2816_s7 + $0x8] sm:$0xff]   ;;  %v2176_v12 = vld [vmem:[%s2816_s7] sm:$0xff]  }
 0x13d   : > { %1388 = vmatpush2.bf16.msra.mxu1 %v2151_v13  ;;  %1429 = vmatpush2.bf16.msra.mxu0 %v2154_v14  ;;  %v1820_v13 = vld [vmem:[%s2815_s6 + $0x4] sm:$0xf] }
 0x13e   : > { %1389 = vmatprep.subr.bf16.mxu1 %v2159_v15  ;;  %1430 = vmatprep.subr.bf16.mxu0 %v2162_v16  ;;  %v1024_v14 = vrot.slane %v1820_v13, %v501_v27  ;;  %v1028_v15 = vrot.slane %v1820_v13, %v505_v29  ;;  %v1036_v27 = vrot.slane %v1820_v13, %v513_v39 }
 0x13f   : > { %v1032_v29 = vrot.slane %v1820_v13, %v509_v46 }
 0x141   : > { %1390 = vmatpush2.bf16.msra.mxu1 %v2157_v19  ;;  %1431 = vmatpush2.bf16.msra.mxu0 %v2160_v20 }
 0x142   : > { %1391 = vmatprep.subr.bf16.mxu1 %v2165_v21  ;;  %1432 = vmatprep.subr.bf16.mxu0 %v2168_v22 }
 0x145   : > { %1392 = vmatpush2.bf16.msra.mxu1 %v2163_v23  ;;  %1433 = vmatpush2.bf16.msra.mxu0 %v2166_v24 }
 0x146   : > { %1938 = vmatprep.subr.bf16.mxu1 %v2232_v4 }
 0x1c8   : > { %v873_v32 = vpop.f32.mrf.mxu1  ;;  %v914_v33 = vpop.f32.mrf.mxu0 }
 0x1c9   : > { %v874_v34 = vadd.f32 %v873_v32, %v502_v30  ;;  %v915_v51 = vadd.f32 %v914_v33, %v510_v48 }
 0x1ca   : > { %v875_v35 = vpop.f32.mrf.mxu1  ;;  %v916_v36 = vpop.f32.mrf.mxu0 }
 0x1cb   : > { %v1753_v37 = vmul.f32 -1.442695, %v874_v34  ;;  %v876_v38 = vadd.f32 %v875_v35, %v506_v31  ;;  %v917_v47 = vadd.f32 %v916_v36, %v514_v45 }
 0x1cc   : > { %v877_v40 = vpop.f32.mrf.mxu1  ;;  %v918_v41 = vpop.f32.mrf.mxu0 }
 0x1cd   : > { %2177 = vpow2.f32 %v1753_v37  ;;  %v1754_v42 = vmul.f32 -1.442695, %v876_v38  ;;  %v1755_v49 = vmul.f32 -1.442695, %v917_v47 }
 0x1ce   : > { %v878_v43 = vpop.f32.mrf.mxu1  ;;  %v919_v44 = vpop.f32.mrf.mxu0 }
 0x1cf   : > { %2179 = vpow2.f32 %v1754_v42  ;;  %v950_v42 = vld [vmem:[#allocation3 + $0x2] sm:$0x3] }
 0x1d0   : > { %2181 = vpow2.f32 %v1755_v49 }
 0x1da   : > { %v2178_v50 = vpop.eup %2177 }
 0x1db   : > { %v924_v52 = vadd.f32 1.0, %v2178_v50 }
 0x1dc   : > { %v2180_v53 = vpop.eup %2179 }
 0x1dd   : > { %2183 = vrcp.f32 %v924_v52  ;;  %v930_v54 = vadd.f32 1.0, %v2180_v53  ;;  %v2182_v55 = vpop.eup %2181 }
 0x1de   : > { %2185 = vtanh.f32 %v915_v51  ;;  %v937_v60 = vadd.f32 1.0, %v2182_v55  ;;  %v1888_v51 = vld [vmem:[%s2817_s8] ss:$0 sm:$0xff] }
 0x1df   : > { %2187 = vrcp.f32 %v930_v54 }
 0x1e0   : > { %2189 = vrcp.f32 %v937_v60 }
 0x1ea   : > { %v2184_v56 = vpop.eup %2183 }
 0x1eb   : > { %v2186_v58 = vpop.eup %2185 }
 0x1ec   : > { %v2188_v59 = vpop.eup %2187  ;;  %v941_v61 = vmul.f32 %v2186_v58, %v2184_v56  ;;  %v1583_v58 = vand.u32 127, %v499_v25 }
 0x1ed   : > { %v940_v62 = vmul.f32 %v2188_v59, %v430_v57  ;;  %v2190_v0 = vpop.eup %2189 }
 0x1ef   : > { %v942_v63 = vadd.f32 %v941_v61, %v940_v62 }
 0x1f1   : > { %946 = vst [vmem:[#allocation3] sm:$0x3] %v942_v63  ;;  %2191 = vtanh.f32 %v942_v63 }
 0x1fe   : > { %v2192_v1 = vpop.eup %2191 }
 0x1ff   : > { %v944_v2 = vmul.f32 %v2192_v1, %v2190_v0 }
 0x201   : > { %945 = vst [vmem:[#allocation2] sm:$0x3] %v944_v2  ;;  %v951_v3 = vpack.c.bf16 %v944_v2, %v944_v2 }
 0x203   : > { %1394 = vmatmul.mubr.bf16.vlgmr.msra.gmra.mxu1 %v951_v3  ;;  %1435 = vmatmul.mubr.bf16.vlgmr.msra.gmra.mxu0 %v951_v3 }
 0x204   : > { %1954 = vmatprep.mubr.msk.bf16.mxu1 %vm2233_vm0, %v2232_v4  ;;  %1939 = vmatpush3.bf16.msra.mxu1 %v2169_v5 }
 0x205   : > { %1940 = vmatprep.subr.bf16.mxu1 %v2232_v4 }
 0x208   : > { %1941 = vmatpush3.bf16.msra.mxu1 %v2170_v6 }
 0x209   : > { %1942 = vmatprep.subr.bf16.mxu1 %v2232_v4 }
 0x20c   : > { %1943 = vmatpush3.bf16.msra.mxu1 %v2171_v7 }
 0x20d   : > { %1944 = vmatprep.subr.bf16.mxu1 %v2232_v4 }
 0x210   : > { %1945 = vmatpush3.bf16.msra.mxu1 %v2172_v8  ;;  %v1612_v8 = vld [vmem:[%s2302_s19] sm:$0x3] }
 0x211   : > { %1946 = vmatprep.subr.bf16.mxu1 %v2232_v4 }
 0x214   : > { %1947 = vmatpush3.bf16.msra.mxu1 %v2173_v9 }
 0x215   : > { %1948 = vmatprep.subr.bf16.mxu1 %v2232_v4 }
 0x218   : > { %1949 = vmatpush3.bf16.msra.mxu1 %v2174_v10 }
 0x219   : > { %1950 = vmatprep.subr.bf16.mxu1 %v2232_v4 }
 0x21c   : > { %1951 = vmatpush3.bf16.msra.mxu1 %v2175_v11 }
 0x21d   : > { %1952 = vmatprep.subr.bf16.mxu1 %v2232_v4 }
 0x220   : > { %1953 = vmatpush3.bf16.msra.mxu1 %v2176_v12 }
 0x2c3   : > { %v1395_v16 = vpop.f32.mrf.mxu1  ;;  %v1436_v17 = vpop.f32.mrf.mxu0 }
 0x2c4   : > { %v1396_v18 = vadd.f32 %v1395_v16, %v1024_v14  ;;  %v1437_v35 = vadd.f32 %v1436_v17, %v1032_v29 }
 0x2c5   : > { %v1397_v19 = vpop.f32.mrf.mxu1  ;;  %v1438_v20 = vpop.f32.mrf.mxu0 }
 0x2c6   : > { %v1885_v21 = vmul.f32 -1.442695, %v1396_v18  ;;  %v1398_v22 = vadd.f32 %v1397_v19, %v1028_v15  ;;  %v1439_v32 = vadd.f32 %v1438_v20, %v1036_v27 }
 0x2c7   : > { %v1399_v23 = vpop.f32.mrf.mxu1  ;;  %v1440_v24 = vpop.f32.mrf.mxu0 }
 0x2c8   : > { %2193 = vpow2.f32 %v1885_v21  ;;  %v1886_v28 = vmul.f32 -1.442695, %v1398_v22  ;;  %v1887_v33 = vmul.f32 -1.442695, %v1439_v32 }
 0x2c9   : > { %v1400_v30 = vpop.f32.mrf.mxu1  ;;  %v1441_v31 = vpop.f32.mrf.mxu0 }
 0x2ca   : > { %2195 = vpow2.f32 %v1886_v28 }
 0x2cb   : > { %2197 = vpow2.f32 %v1887_v33 }
 0x2d5   : > { %v2194_v34 = vpop.eup %2193 }
 0x2d6   : > { %v1446_v36 = vadd.f32 1.0, %v2194_v34 }
 0x2d7   : > { %v2196_v37 = vpop.eup %2195 }
 0x2d8   : > { %2199 = vrcp.f32 %v1446_v36  ;;  %v1452_v38 = vadd.f32 1.0, %v2196_v37  ;;  %v2198_v40 = vpop.eup %2197 }
 0x2d9   : > { %2201 = vtanh.f32 %v1437_v35  ;;  %v1459_v39 = vadd.f32 1.0, %v2198_v40 }
 0x2da   : > { %2203 = vrcp.f32 %v1452_v38 }
 0x2db   : > { %2205 = vrcp.f32 %v1459_v39 }
 0x2e5   : > { %v2200_v41 = vpop.eup %2199 }
 0x2e6   : > { %v2202_v43 = vpop.eup %2201 }
 0x2e7   : > { %v2204_v44 = vpop.eup %2203  ;;  %v1463_v45 = vmul.f32 %v2202_v43, %v2200_v41 }
 0x2e8   : > { %v1462_v47 = vmul.f32 %v2204_v44, %v950_v42  ;;  %v2206_v46 = vpop.eup %2205 }
 0x2ea   : > { %v1464_v26 = vadd.f32 %v1463_v45, %v1462_v47 }
 0x2ec   : > { %1468 = vst [vmem:[#allocation3 + $0x2] sm:$0x3] %v1464_v26  ;;  %2207 = vtanh.f32 %v1464_v26 }
 0x2f9   : > { %v2208_v48 = vpop.eup %2207 }
 0x2fa   : > { %v1466_v49 = vmul.f32 %v2208_v48, %v2206_v46 }
 0x2fc   : > { %1467 = vst [vmem:[#allocation2 + $0x2] sm:$0x3] %v1466_v49  ;;  %v1469_v50 = vpack.c.bf16 %v1466_v49, %v1466_v49 }
 0x2fe   : > { %1955 = vmatmul.mubr.bf16.vlgmr.msra.gmra.mxu1 %v1469_v50 }
 0x3be   : > { %v1575_v52 = vpop.f32.mrf.mxu1 }
 0x3bf   : > { %v1576_v53 = vadd.f32 %v1888_v51, %v1575_v52 }
 0x3c0   : > { %v1956_v54 = vpop.f32.mrf.mxu1 }
 0x3c1   : > { %1581 = vst [vmem:[%s2307_s22] sm:$0x3] %v1576_v53  ;;  %v1585_v55 = vsel %vm1584_vm1, %v1576_v53, -inf  ;;  %s1608_s22 = sld [smem:[#allocation6 + %s2293_s0]] }
 0x3c2   : > { %1586 = vmax.xlane.f32.xlu0 %v1585_v55  ;;  %v1578_v56 = vpop.f32.mrf.mxu1 }
 0x3c4   : > { %v1957_v57 = vpop.f32.mrf.mxu1 }
 0x3c7   : > { %p1609_p10 = scmp.eq.s32.totalorder %s1608_s22, 1 }
 0x3c9   : > { %s1610_s12 = scalar_select %p1609_p10, 1, 0 }
 0x3cb   : > { %s1611_s13 = scvt.s32.f32 %s1610_s12 }
 0x3cd   : > { %s1615_s15 = ssub.f32 1.0, %s1611_s13  ;;  %v1613_v9 = vstv %s1611_s13 }
 0x3ce   : > { %v1614_v12 = vmul.f32 %v1613_v9, %v1612_v8 }
 0x3cf   : > { %v1616_v11 = vstv %s1615_s15 }
 0x44b   : > { %v1587_v59 = vpop.xlane.xlu0 %1586 }
 0x44c   : > { %vm1588_vm2 = vcmp.eq.f32.partialorder %v1576_v53, %v1587_v59 }
 0x44d   : > { %v1589_v60 = vsel %vm1588_vm2, %v1583_v58, 128 }
 0x44e   : > { %v1590_v61 = vsel %vm1584_vm1, %v1589_v60, 2147483647 }
 0x44f   : > { %v1592_v62 = vshra.s32 %v1590_v61, 16  ;;  %v1591_v0 = vand.u32 65535, %v1590_v61 }
 0x451   : > { %v1594_v63 = vcvt.s32.f32 %v1592_v62  ;;  %v1593_v2 = vcvt.s32.f32 %v1591_v0 }
 0x453   : > { %1595 = vmin.xlane.f32.xlu0 %v1594_v63 }
 0x4dc   : > { %v1596_v1 = vpop.xlane.xlu0 %1595 }
 0x4dd   : > { %vm1597_vm3 = vcmp.eq.f32.partialorder %v1594_v63, %v1596_v1  ;;  %v1602_v5 = vcvt.f32.s32 %v1596_v1 }
 0x4de   : > { %v1598_v3 = vsel %vm1597_vm3, %v1593_v2, inf }
 0x4df   : > { %1599 = vmin.xlane.f32.xlu1 %v1598_v3  ;;  %v1603_v6 = vshll.u32 %v1602_v5, 16 }
 0x568   : > { %v1600_v25 = vpop.xlane.xlu1 %1599 }
 0x569   : > { %v1601_v7 = vcvt.f32.s32 %v1600_v25 }
 0x56b   : > { %v1604_v10 = vadd.s32 %v1603_v6, %v1601_v7 }
 0x56d   : > { %vm1605_vm4 = vcmp.eq.s32.totalorder %v1583_v58, %v1604_v10 }
 0x56e   : > { %v1897_v13 = vsel %vm1605_vm4, 1.0, %v2232_v4 }
 0x56f   : > { %v1617_v14 = vmul.f32 %v1897_v13, %v1616_v11 }
 0x571   : > { %v1618_v15 = vadd.f32 %v1617_v14, %v1614_v12 }
 0x573   : > { %1619 = vst [vmem:[#allocation4] sm:$0x3] %v1618_v15 }
 0x574 PF: > { %s25_s14 = sadd.s32 1, %s2229_s14  }
 0x575   : > { %p22_p11 = scmp.ge.s32.totalorder %s25_s14, 10  }
 0x577   :  { %24 = sbr.rel (!%p22_p11) target bundleno = 16 (0x10), region = 90 }

</bundles_post_ra>
